<compile_context>
chip_gen: v7x
topology: tpu7x:2x2x1
jax: 0.10.0
libtpu: 0.0.40
codegen_flags: <defaults>
</compile_context>

<pallas_src>
import math
import functools

import jax
import jax.numpy as jnp
from jax.experimental import pallas as pl
from jax.experimental.pallas import tpu as pltpu

LANE = 128


def _round_up(x, m):
    return ((x + m - 1) // m) * m


def _sublane(dtype):
    return 16 if jnp.dtype(dtype).itemsize == 2 else 8


def _vmem_capacity_bytes():
    """Per-TensorCore VMEM capacity with a generation-aware fallback."""
    try:
        return int(pltpu.get_tpu_info().vmem_capacity_bytes)
    except Exception:
        pass
    try:
        kind = jax.devices()[0].device_kind.lower()
    except Exception:
        kind = ""
    if "v7" in kind:
        return 64 * 1024 * 1024      # v7x: 64 MiB / TensorCore
    return 128 * 1024 * 1024         # v5e / v6e: 128 MiB / TensorCore


# --------------------- fused whole-MLP kernel (small/medium) ---------------

def _fused_mlp_kernel(*refs, n_layers, compute_dtype):
    # refs = (x_ref, w0, b0, w1, b1, ..., o_ref); one batch tile per grid step.
    x_ref = refs[0]
    o_ref = refs[1 + 2 * n_layers]
    h = x_ref[...]
    for l in range(n_layers):
        w = refs[1 + 2 * l][...]
        b = refs[2 + 2 * l][...]
        y = jnp.dot(h, w, preferred_element_type=jnp.float32)   # MXU, f32 acc
        y = y + b.astype(jnp.float32)
        if l < n_layers - 1:
            h = jnp.maximum(y, 0.0).astype(compute_dtype)       # stays on-chip
        else:
            h = y
    o_ref[...] = h.astype(o_ref.dtype)


def fused_mlp(x_pad, params_padded, compute_dtype, tm, vmem_limit_bytes,
              resident_single_buffer=True):
    m_pad, k0_pad = x_pad.shape
    n_layers = len(params_padded)
    n_out_pad = params_padded[-1][0].shape[1]

    def resident_spec(shape):
        # Constant index map => fetched once; a single buffer halves the
        # resident footprint vs. the default double-buffering.
        if resident_single_buffer:
            return pl.BlockSpec(shape, lambda i: (0, 0),
                                pipeline_mode=pl.Buffered(buffer_count=1))
        return pl.BlockSpec(shape, lambda i: (0, 0))

    in_specs = [pl.BlockSpec((tm, k0_pad), lambda i: (i, 0))]
    inputs = [x_pad]
    for (w, b) in params_padded:
        kp, np_ = w.shape
        in_specs.append(resident_spec((kp, np_)))
        in_specs.append(resident_spec((1, np_)))
        inputs.append(w)
        inputs.append(b)

    kernel = functools.partial(_fused_mlp_kernel, n_layers=n_layers,
                               compute_dtype=compute_dtype)
    return pl.pallas_call(
        kernel,
        out_shape=jax.ShapeDtypeStruct((m_pad, n_out_pad), jnp.float32),
        grid=(m_pad // tm,),
        in_specs=in_specs,
        out_specs=pl.BlockSpec((tm, n_out_pad), lambda i: (i, 0)),
        compiler_params=pltpu.CompilerParams(
            dimension_semantics=("parallel",),   # batch tiles shard across TCs
            vmem_limit_bytes=int(vmem_limit_bytes)),
    )(*inputs)


# --------------------- tiled per-layer kernel (large configs) --------------

def _tiled_linear_kernel(x_ref, w_ref, b_ref, o_ref, acc_ref, *, apply_relu):
    k = pl.program_id(2)

    @pl.when(k == 0)
    def _():
        acc_ref[...] = jnp.zeros_like(acc_ref)

    acc_ref[...] += jnp.dot(x_ref[...], w_ref[...],
                            preferred_element_type=jnp.float32)

    @pl.when(k == pl.num_programs(2) - 1)
    def _():
        y = acc_ref[...] + b_ref[...].astype(jnp.float32)
        if apply_relu:
            y = jnp.maximum(y, 0.0)
        o_ref[...] = y.astype(o_ref.dtype)


def tiled_linear(x, w, b, apply_relu, out_dtype, *, tm, tn, tk,
                 vmem_limit_bytes):
    m, kdim = x.shape
    kdim2, n = w.shape
    assert kdim == kdim2
    assert m % tm == 0 and n % tn == 0 and kdim % tk == 0
    kernel = functools.partial(_tiled_linear_kernel, apply_relu=apply_relu)
    return pl.pallas_call(
        kernel,
        out_shape=jax.ShapeDtypeStruct((m, n), out_dtype),
        grid_spec=pltpu.PrefetchScalarGridSpec(
            num_scalar_prefetch=0,
            grid=(m // tm, n // tn, kdim // tk),
            in_specs=[
                pl.BlockSpec((tm, tk), lambda i, j, k: (i, k)),
                pl.BlockSpec((tk, tn), lambda i, j, k: (k, j)),
                pl.BlockSpec((1, tn), lambda i, j, k: (0, j)),
            ],
            out_specs=pl.BlockSpec((tm, tn), lambda i, j, k: (i, j)),
            scratch_shapes=[pltpu.VMEM((tm, tn), jnp.float32)],
        ),
        compiler_params=pltpu.CompilerParams(
            dimension_semantics=("parallel", "parallel", "arbitrary"),
            vmem_limit_bytes=int(vmem_limit_bytes)),
    )(x, w, b)


# ------------------------------- PlainFC model -----------------------------

class PlainFCPallas:
    """JAX/Pallas replica of PlainFC.forward (act='relu')."""

    def __init__(self, input_size, layers, act, widening, classes=10,
                 first_layer=None, compute_dtype=jnp.bfloat16, key=None,
                 force_path="auto"):
        assert act.lower() == "relu"
        assert force_path in ("auto", "fused", "tiled")
        self.compute_dtype = jnp.dtype(compute_dtype)
        self.classes = classes
        self.force_path = force_path

        if first_layer is None:
            layer_specs = [input_size * input_size * widening ** i
                           for i in range(layers + 1)]
        else:
            layer_specs = [input_size * input_size] + \
                          [first_layer * widening ** i for i in range(layers)]
        layer_specs = layer_specs[0:layers + 1]
        self.in_features = layer_specs[0]

        dims = []
        last_ch = layer_specs[0]
        if layers > 0:
            dims.append((last_ch, layer_specs[1]))
            last_ch = layer_specs[1]
        for ch_out in layer_specs[2:]:
            dims.append((last_ch, ch_out))
            last_ch = ch_out
        dims.append((last_ch, classes))          # final classifier layer
        self.dims = dims

        key = jax.random.PRNGKey(0) if key is None else key
        self.params_padded = []  # list of (W_t (K_pad, N_pad), b (1, N_pad) f32)
        for li, (cin, cout) in enumerate(dims):
            key, kw, kb = jax.random.split(key, 3)
            bound = 1.0 / math.sqrt(cin)
            w = jax.random.uniform(kw, (cout, cin), jnp.float32,
                                   minval=-bound, maxval=bound)
            if li == len(dims) - 1:
                # PyTorch default nn.Linear init for the classifier bias.
                b = jax.random.uniform(kb, (cout,), jnp.float32,
                                       minval=-bound, maxval=bound)
            else:
                b = jnp.zeros((cout,), jnp.float32)      # init_layer: b = 0
            # Pad once at init to lane-dense (multiple-of-128) shapes; store
            # W transposed (K, N) in compute dtype, bias as f32 (1, N_pad).
            kpad = _round_up(cin, LANE)
            npad = _round_up(cout, LANE)
            wt = jnp.zeros((kpad, npad), jnp.float32).at[:cin, :cout].set(w.T)
            bp = jnp.zeros((1, npad), jnp.float32).at[0, :cout].set(b)
            self.params_padded.append((wt.astype(self.compute_dtype), bp))

    # ---- VMEM budgeting ----------------------------------------------------
    def _fused_bytes(self, tm, k0_pad, n_out_pad, resident_single_buffer=True):
        isz = self.compute_dtype.itemsize
        total = 2 * tm * k0_pad * isz            # double-buffered x tile
        total += 2 * tm * n_out_pad * 4          # double-buffered f32 out tile
        wmul = 1 if resident_single_buffer else 2
        max_w = 0
        for (w, b) in self.params_padded:
            total += wmul * w.size * w.dtype.itemsize
            total += wmul * b.size * b.dtype.itemsize
            max_w = max(max_w, w.shape[1])
        total += 3 * tm * max_w * 4              # live activations / temps
        return total

    def _fused_fits(self, tm, k0_pad, n_out_pad):
        budget = int(_vmem_capacity_bytes() * 0.7)
        return self._fused_bytes(tm, k0_pad, n_out_pad) <= budget

    def _vmem_limit_fused(self, tm, k0_pad, n_out_pad, resident):
        cap = _vmem_capacity_bytes()
        need = self._fused_bytes(tm, k0_pad, n_out_pad, resident) + (4 << 20)
        return min(int(cap * 0.9), max(32 << 20, need))

    def _fused_tiles(self, B, sub, k0_pad, n_out_pad):
        budget = int(_vmem_capacity_bytes() * 0.7)
        tm = min(512, _round_up(B, sub))         # big batch tiles amortize steps
        while tm > sub and self._fused_bytes(tm, k0_pad, n_out_pad) > budget:
            tm = max(sub, _round_up(tm // 2, sub))
        m_pad = _round_up(B, tm)
        # Emit >= 2 batch-parallel grid steps so v7x's two TensorCores both work.
        if m_pad // tm < 2:
            half = _round_up(max(sub, tm // 2), sub)
            if half < tm:
                tm = half
                m_pad = _round_up(B, tm)
            if m_pad // tm < 2:
                m_pad = 2 * tm                   # pad batch: zero rows are cheap
        return tm, m_pad

    def _select_tiles(self, kdim, ndim, tm, budget):
        # Prefer large lane-dense tiles (tn=512 feeds the 256-wide MXU of
        # v6e/v7x; big tk cuts grid steps / x-tile re-reads) within budget.
        isz = self.compute_dtype.itemsize
        for tn in (512, 256, 128):
            if ndim % tn:
                continue
            for tk in (2048, 1024, 512, 256, 128):
                if kdim % tk:
                    continue
                need = (2 * tm * tk * isz        # x tiles (double buffered)
                        + 2 * tk * tn * isz      # w tiles (double buffered)
                        + 2 * tn * 4             # bias tiles
                        + 2 * tm * tn * 4        # out tiles (worst case f32)
                        + tm * tn * 4)           # f32 accumulator scratch
                if need <= budget:
                    return tn, tk
        return min(ndim, 128), min(kdim, 128)

    # ---- forward paths -------------------------------------------------------
    def _forward_fused(self, h, B, k0_pad, n_out_pad):
        cdt = self.compute_dtype
        sub = _sublane(cdt)
        tm, m_pad = self._fused_tiles(B, sub, k0_pad, n_out_pad)
        xp = jnp.zeros((m_pad, k0_pad), cdt)
        xp = xp.at[:B, :self.in_features].set(h.astype(cdt))
        # Try single-buffered resident weights first; fall back to default
        # double-buffering, then (by returning None) to the tiled path.
        for resident in (True, False):
            limit = self._vmem_limit_fused(tm, k0_pad, n_out_pad, resident)
            try:
                return fused_mlp(xp, self.params_padded, cdt, tm, limit,
                                 resident_single_buffer=resident)
            except Exception:
                continue
        return None

    def _forward_tiled(self, h, B, k0_pad):
        cdt = self.compute_dtype
        cap = _vmem_capacity_bytes()
        vmem_limit = int(cap * 0.75)             # ~96 MiB v5e/v6e, ~48 MiB v7x
        tile_budget = vmem_limit // 2
        # M tile decoupled from the batch: pad the batch up to 256-512 rows so
        # weights are streamed once per (i, j) tile and the MXU sees deep M.
        tm = max(256, min(512, _round_up(B, 256)))
        m_pad = _round_up(B, tm)
        xp = jnp.zeros((m_pad, k0_pad), cdt)
        xp = xp.at[:B, :self.in_features].set(h.astype(cdt))
        # TODO(synk): fuse consecutive tiled layers in one pallas_call (keep
        # activations resident, stream weights via emit_pipeline) when the
        # activation slab fits VMEM but the weight stack does not.
        hcur = xp
        nl = len(self.params_padded)
        for li, (w, b) in enumerate(self.params_padded):
            last = (li == nl - 1)
            kdim, ndim = w.shape
            tn, tk = self._select_tiles(kdim, ndim, tm, tile_budget)
            out_dtype = jnp.float32 if last else cdt
            hcur = tiled_linear(hcur, w, b, apply_relu=not last,
                                out_dtype=out_dtype, tm=tm, tn=tn, tk=tk,
                                vmem_limit_bytes=vmem_limit)
        return hcur

    def forward(self, x):
        B = x.shape[0]
        h = x.reshape(B, -1).astype(jnp.float32)   # row-major, == torch .view
        assert h.shape[1] == self.in_features

        sub = _sublane(self.compute_dtype)
        k0_pad = self.params_padded[0][0].shape[0]
        n_out_pad = self.params_padded[-1][0].shape[1]

        path = self.force_path
        if path == "auto":
            # Residency check at the smallest batch tile: the dominant term is
            # the (tm-independent) weight stack.
            path = "fused" if self._fused_fits(sub, k0_pad, n_out_pad) else "tiled"

        out = None
        if path == "fused":
            out = self._forward_fused(h, B, k0_pad, n_out_pad)
        if out is None:
            out = self._forward_tiled(h, B, k0_pad)

        return out[:B, :self.classes]


# ----------------------------- reference (pure JAX) -------------------------

def reference_forward(model, x):
    """Mirrors the kernel math exactly (same padded params / dtypes)."""
    B = x.shape[0]
    h = x.reshape(B, -1).astype(jnp.float32)
    cdt = model.compute_dtype
    k0_pad = model.params_padded[0][0].shape[0]
    hp = jnp.zeros((B, k0_pad), jnp.float32).at[:, :model.in_features].set(h)
    a = hp.astype(cdt)
    n = len(model.params_padded)
    for i, (w, b) in enumerate(model.params_padded):
        y = jnp.dot(a.astype(cdt), w, preferred_element_type=jnp.float32)
        y = y + b.astype(jnp.float32)
        if i < n - 1:
            a = jnp.maximum(y, 0.0).astype(cdt)
        else:
            a = y
    return a[:, :model.classes]


# ----------------------------------- main -----------------------------------

if __name__ == "__main__":
    key = jax.random.PRNGKey(0)
    k1, k2, k3, kp1, kp2, kp3 = jax.random.split(key, 6)

    # 1) Small config, fused single-kernel path, float32 (tight tolerance).
    model_f32 = PlainFCPallas(8, 2, "relu", 1, classes=10,
                              compute_dtype=jnp.float32, key=kp1,
                              force_path="fused")
    x1 = jax.random.normal(k1, (4, 1, 8, 8), jnp.float32)
    out1 = jax.block_until_ready(model_f32.forward(x1))
    ref1 = reference_forward(model_f32, x1)
    assert out1.shape == (4, 10)
    assert jnp.allclose(out1, ref1, atol=1e-5, rtol=1e-5), \
        float(jnp.max(jnp.abs(out1 - ref1)))

    # 2) Same config, fused path, default bf16 weights/activations + f32 acc.
    model_bf16 = PlainFCPallas(8, 2, "relu", 1, classes=10, key=kp2,
                               force_path="fused")
    x2 = jax.random.normal(k2, (4, 1, 8, 8), jnp.float32)
    out2 = jax.block_until_ready(model_bf16.forward(x2))
    ref2 = reference_forward(model_bf16, x2)
    assert out2.shape == (4, 10)
    assert jnp.allclose(out2, ref2, atol=2e-2, rtol=2e-2), \
        float(jnp.max(jnp.abs(out2 - ref2)))

    # 3) Larger config, forced M/N/K-tiled path (exercises the accumulator
    #    init / pl.when epilogue, large-tile selection and batch padding), bf16.
    model_tiled = PlainFCPallas(16, 2, "relu", 2, classes=10, key=kp3,
                                force_path="tiled")
    x3 = jax.random.normal(k3, (32, 1, 16, 16), jnp.float32)
    out3 = jax.block_until_ready(model_tiled.forward(x3))
    ref3 = reference_forward(model_tiled, x3)
    assert out3.shape == (32, 10)
    assert jnp.allclose(out3, ref3, atol=5e-2, rtol=5e-2), \
        float(jnp.max(jnp.abs(out3 - ref3)))

    print("KERNEL_OK")
</pallas_src>

<mosaic_0001>
module attributes {stable_mosaic.version = 11 : i64} {
  func.func @_fused_mlp_kernel(%arg0: i32, %arg1: memref<8x128xf32, #tpu.memory_space<vmem>>, %arg2: memref<128x128xf32, #tpu.memory_space<vmem>>, %arg3: memref<1x128xf32, #tpu.memory_space<vmem>>, %arg4: memref<128x128xf32, #tpu.memory_space<vmem>>, %arg5: memref<1x128xf32, #tpu.memory_space<vmem>>, %arg6: memref<128x128xf32, #tpu.memory_space<vmem>>, %arg7: memref<1x128xf32, #tpu.memory_space<vmem>>, %arg8: memref<8x128xf32, #tpu.memory_space<vmem>>) attributes {dimension_semantics = [#tpu.dimension_semantics<parallel>], iteration_bounds = array<i64: 2>, scalar_prefetch = 0 : i64, scratch_operands = 0 : i64, tpu.core_type = #tpu.core_type<tc>, window_params = [{transform_indices = @transform_0, window_bounds = array<i64: 8, 128>}, {pipeline_mode = #tpu.pipeline_mode<synchronous>, transform_indices = @transform_1, window_bounds = array<i64: 128, 128>}, {pipeline_mode = #tpu.pipeline_mode<synchronous>, transform_indices = @transform_2, window_bounds = array<i64: 1, 128>}, {pipeline_mode = #tpu.pipeline_mode<synchronous>, transform_indices = @transform_3, window_bounds = array<i64: 128, 128>}, {pipeline_mode = #tpu.pipeline_mode<synchronous>, transform_indices = @transform_4, window_bounds = array<i64: 1, 128>}, {pipeline_mode = #tpu.pipeline_mode<synchronous>, transform_indices = @transform_5, window_bounds = array<i64: 128, 128>}, {pipeline_mode = #tpu.pipeline_mode<synchronous>, transform_indices = @transform_6, window_bounds = array<i64: 1, 128>}, {transform_indices = @transform_7, window_bounds = array<i64: 8, 128>}]} {
    %c0 = arith.constant 0 : index
    %c0_0 = arith.constant 0 : index
    %0 = vector.load %arg1[%c0, %c0_0] : memref<8x128xf32, #tpu.memory_space<vmem>>, vector<8x128xf32>
    %c0_1 = arith.constant 0 : index
    %c0_2 = arith.constant 0 : index
    %1 = vector.load %arg2[%c0_1, %c0_2] : memref<128x128xf32, #tpu.memory_space<vmem>>, vector<128x128xf32>
    %c0_3 = arith.constant 0 : index
    %c0_4 = arith.constant 0 : index
    %2 = vector.load %arg3[%c0_3, %c0_4] : memref<1x128xf32, #tpu.memory_space<vmem>>, vector<1x128xf32>
    %cst = arith.constant dense<0.000000e+00> : vector<8x128xf32>
    %3 = tpu.matmul %0, %1, %cst {dimension_numbers = #tpu.dot_dimension_numbers<[1], [0], [0], [1], [0, 0, 1, 1], [], []>} : vector<8x128xf32>, vector<128x128xf32>, vector<8x128xf32> -> vector<8x128xf32>
    %4 = vector.broadcast %2 : vector<1x128xf32> to vector<8x128xf32>
    %5 = arith.addf %3, %4 : vector<8x128xf32>
    %cst_5 = arith.constant 0.000000e+00 : f32
    %6 = vector.broadcast %cst_5 : f32 to vector<8x128xf32>
    %7 = arith.maximumf %5, %6 : vector<8x128xf32>
    %c0_6 = arith.constant 0 : index
    %c0_7 = arith.constant 0 : index
    %8 = vector.load %arg4[%c0_6, %c0_7] : memref<128x128xf32, #tpu.memory_space<vmem>>, vector<128x128xf32>
    %c0_8 = arith.constant 0 : index
    %c0_9 = arith.constant 0 : index
    %9 = vector.load %arg5[%c0_8, %c0_9] : memref<1x128xf32, #tpu.memory_space<vmem>>, vector<1x128xf32>
    %cst_10 = arith.constant dense<0.000000e+00> : vector<8x128xf32>
    %10 = tpu.matmul %7, %8, %cst_10 {dimension_numbers = #tpu.dot_dimension_numbers<[1], [0], [0], [1], [0, 0, 1, 1], [], []>} : vector<8x128xf32>, vector<128x128xf32>, vector<8x128xf32> -> vector<8x128xf32>
    %11 = vector.broadcast %9 : vector<1x128xf32> to vector<8x128xf32>
    %12 = arith.addf %10, %11 : vector<8x128xf32>
    %cst_11 = arith.constant 0.000000e+00 : f32
    %13 = vector.broadcast %cst_11 : f32 to vector<8x128xf32>
    %14 = arith.maximumf %12, %13 : vector<8x128xf32>
    %c0_12 = arith.constant 0 : index
    %c0_13 = arith.constant 0 : index
    %15 = vector.load %arg6[%c0_12, %c0_13] : memref<128x128xf32, #tpu.memory_space<vmem>>, vector<128x128xf32>
    %c0_14 = arith.constant 0 : index
    %c0_15 = arith.constant 0 : index
    %16 = vector.load %arg7[%c0_14, %c0_15] : memref<1x128xf32, #tpu.memory_space<vmem>>, vector<1x128xf32>
    %cst_16 = arith.constant dense<0.000000e+00> : vector<8x128xf32>
    %17 = tpu.matmul %14, %15, %cst_16 {dimension_numbers = #tpu.dot_dimension_numbers<[1], [0], [0], [1], [0, 0, 1, 1], [], []>} : vector<8x128xf32>, vector<128x128xf32>, vector<8x128xf32> -> vector<8x128xf32>
    %18 = vector.broadcast %16 : vector<1x128xf32> to vector<8x128xf32>
    %19 = arith.addf %17, %18 : vector<8x128xf32>
    %c0_17 = arith.constant 0 : index
    %c0_18 = arith.constant 0 : index
    %20 = vector.load %arg8[%c0_17, %c0_18] : memref<8x128xf32, #tpu.memory_space<vmem>>, vector<8x128xf32>
    tpu.vector_store %arg8[%c0_17, %c0_18], %19 {strides = array<i32>} : memref<8x128xf32, #tpu.memory_space<vmem>>, vector<8x128xf32>,
    return
  }
  func.func @transform_0(%arg0: i32) -> (i32, i32) {
    %c0_i32 = arith.constant 0 : i32
    %c0_i32_0 = arith.constant 0 : i32
    return %arg0, %c0_i32 : i32, i32
  }
  func.func @transform_1(%arg0: i32) -> (i32, i32) {
    %c0_i32 = arith.constant 0 : i32
    %c0_i32_0 = arith.constant 0 : i32
    %c0_i32_1 = arith.constant 0 : i32
    return %c0_i32, %c0_i32_0 : i32, i32
  }
  func.func @transform_2(%arg0: i32) -> (i32, i32) {
    %c0_i32 = arith.constant 0 : i32
    %c0_i32_0 = arith.constant 0 : i32
    %c0_i32_1 = arith.constant 0 : i32
    return %c0_i32, %c0_i32_0 : i32, i32
  }
  func.func @transform_3(%arg0: i32) -> (i32, i32) {
    %c0_i32 = arith.constant 0 : i32
    %c0_i32_0 = arith.constant 0 : i32
    %c0_i32_1 = arith.constant 0 : i32
    return %c0_i32, %c0_i32_0 : i32, i32
  }
  func.func @transform_4(%arg0: i32) -> (i32, i32) {
    %c0_i32 = arith.constant 0 : i32
    %c0_i32_0 = arith.constant 0 : i32
    %c0_i32_1 = arith.constant 0 : i32
    return %c0_i32, %c0_i32_0 : i32, i32
  }
  func.func @transform_5(%arg0: i32) -> (i32, i32) {
    %c0_i32 = arith.constant 0 : i32
    %c0_i32_0 = arith.constant 0 : i32
    %c0_i32_1 = arith.constant 0 : i32
    return %c0_i32, %c0_i32_0 : i32, i32
  }
  func.func @transform_6(%arg0: i32) -> (i32, i32) {
    %c0_i32 = arith.constant 0 : i32
    %c0_i32_0 = arith.constant 0 : i32
    %c0_i32_1 = arith.constant 0 : i32
    return %c0_i32, %c0_i32_0 : i32, i32
  }
  func.func @transform_7(%arg0: i32) -> (i32, i32) {
    %c0_i32 = arith.constant 0 : i32
    %c0_i32_0 = arith.constant 0 : i32
    return %arg0, %c0_i32 : i32, i32
  }
}

module attributes {stable_mosaic.version = 11 : i64} {
  func.func @_fused_mlp_kernel(%arg0: i32, %arg1: memref<8x128xf32, #tpu.memory_space<vmem>>, %arg2: memref<128x128xf32, #tpu.memory_space<vmem>>, %arg3: memref<1x128xf32, #tpu.memory_space<vmem>>, %arg4: memref<128x128xf32, #tpu.memory_space<vmem>>, %arg5: memref<1x128xf32, #tpu.memory_space<vmem>>, %arg6: memref<128x128xf32, #tpu.memory_space<vmem>>, %arg7: memref<1x128xf32, #tpu.memory_space<vmem>>, %arg8: memref<8x128xf32, #tpu.memory_space<vmem>>) attributes {dimension_semantics = [#tpu.dimension_semantics<parallel>], iteration_bounds = array<i64: 2>, scalar_prefetch = 0 : i64, scratch_operands = 0 : i64, tpu.core_type = #tpu.core_type<tc>, window_params = [{transform_indices = @transform_0, window_bounds = array<i64: 8, 128>}, {pipeline_mode = #tpu.pipeline_mode<synchronous>, transform_indices = @transform_1, window_bounds = array<i64: 128, 128>}, {pipeline_mode = #tpu.pipeline_mode<synchronous>, transform_indices = @transform_2, window_bounds = array<i64: 1, 128>}, {pipeline_mode = #tpu.pipeline_mode<synchronous>, transform_indices = @transform_3, window_bounds = array<i64: 128, 128>}, {pipeline_mode = #tpu.pipeline_mode<synchronous>, transform_indices = @transform_4, window_bounds = array<i64: 1, 128>}, {pipeline_mode = #tpu.pipeline_mode<synchronous>, transform_indices = @transform_5, window_bounds = array<i64: 128, 128>}, {pipeline_mode = #tpu.pipeline_mode<synchronous>, transform_indices = @transform_6, window_bounds = array<i64: 1, 128>}, {transform_indices = @transform_7, window_bounds = array<i64: 8, 128>}]} {
    %c0 = arith.constant 0 : index
    %c0_0 = arith.constant 0 : index
    %0 = vector.load %arg1[%c0, %c0_0] : memref<8x128xf32, #tpu.memory_space<vmem>>, vector<8x128xf32>
    %c0_1 = arith.constant 0 : index
    %c0_2 = arith.constant 0 : index
    %1 = vector.load %arg2[%c0_1, %c0_2] : memref<128x128xf32, #tpu.memory_space<vmem>>, vector<128x128xf32>
    %c0_3 = arith.constant 0 : index
    %c0_4 = arith.constant 0 : index
    %2 = vector.load %arg3[%c0_3, %c0_4] : memref<1x128xf32, #tpu.memory_space<vmem>>, vector<1x128xf32>
    %cst = arith.constant dense<0.000000e+00> : vector<8x128xf32>
    %3 = tpu.matmul %0, %1, %cst {dimension_numbers = #tpu.dot_dimension_numbers<[1], [0], [0], [1], [0, 0, 1, 1], [], []>} : vector<8x128xf32>, vector<128x128xf32>, vector<8x128xf32> -> vector<8x128xf32>
    %4 = vector.broadcast %2 : vector<1x128xf32> to vector<8x128xf32>
    %5 = arith.addf %3, %4 : vector<8x128xf32>
    %cst_5 = arith.constant 0.000000e+00 : f32
    %6 = vector.broadcast %cst_5 : f32 to vector<8x128xf32>
    %7 = arith.maximumf %5, %6 : vector<8x128xf32>
    %c0_6 = arith.constant 0 : index
    %c0_7 = arith.constant 0 : index
    %8 = vector.load %arg4[%c0_6, %c0_7] : memref<128x128xf32, #tpu.memory_space<vmem>>, vector<128x128xf32>
    %c0_8 = arith.constant 0 : index
    %c0_9 = arith.constant 0 : index
    %9 = vector.load %arg5[%c0_8, %c0_9] : memref<1x128xf32, #tpu.memory_space<vmem>>, vector<1x128xf32>
    %cst_10 = arith.constant dense<0.000000e+00> : vector<8x128xf32>
    %10 = tpu.matmul %7, %8, %cst_10 {dimension_numbers = #tpu.dot_dimension_numbers<[1], [0], [0], [1], [0, 0, 1, 1], [], []>} : vector<8x128xf32>, vector<128x128xf32>, vector<8x128xf32> -> vector<8x128xf32>
    %11 = vector.broadcast %9 : vector<1x128xf32> to vector<8x128xf32>
    %12 = arith.addf %10, %11 : vector<8x128xf32>
    %cst_11 = arith.constant 0.000000e+00 : f32
    %13 = vector.broadcast %cst_11 : f32 to vector<8x128xf32>
    %14 = arith.maximumf %12, %13 : vector<8x128xf32>
    %c0_12 = arith.constant 0 : index
    %c0_13 = arith.constant 0 : index
    %15 = vector.load %arg6[%c0_12, %c0_13] : memref<128x128xf32, #tpu.memory_space<vmem>>, vector<128x128xf32>
    %c0_14 = arith.constant 0 : index
    %c0_15 = arith.constant 0 : index
    %16 = vector.load %arg7[%c0_14, %c0_15] : memref<1x128xf32, #tpu.memory_space<vmem>>, vector<1x128xf32>
    %cst_16 = arith.constant dense<0.000000e+00> : vector<8x128xf32>
    %17 = tpu.matmul %14, %15, %cst_16 {dimension_numbers = #tpu.dot_dimension_numbers<[1], [0], [0], [1], [0, 0, 1, 1], [], []>} : vector<8x128xf32>, vector<128x128xf32>, vector<8x128xf32> -> vector<8x128xf32>
    %18 = vector.broadcast %16 : vector<1x128xf32> to vector<8x128xf32>
    %19 = arith.addf %17, %18 : vector<8x128xf32>
    %c0_17 = arith.constant 0 : index
    %c0_18 = arith.constant 0 : index
    %20 = vector.load %arg8[%c0_17, %c0_18] : memref<8x128xf32, #tpu.memory_space<vmem>>, vector<8x128xf32>
    tpu.vector_store %arg8[%c0_17, %c0_18], %19 {strides = array<i32>} : memref<8x128xf32, #tpu.memory_space<vmem>>, vector<8x128xf32>,
    return
  }
  func.func @transform_0(%arg0: i32) -> (i32, i32) {
    %c0_i32 = arith.constant 0 : i32
    %c0_i32_0 = arith.constant 0 : i32
    return %arg0, %c0_i32 : i32, i32
  }
  func.func @transform_1(%arg0: i32) -> (i32, i32) {
    %c0_i32 = arith.constant 0 : i32
    %c0_i32_0 = arith.constant 0 : i32
    %c0_i32_1 = arith.constant 0 : i32
    return %c0_i32, %c0_i32_0 : i32, i32
  }
  func.func @transform_2(%arg0: i32) -> (i32, i32) {
    %c0_i32 = arith.constant 0 : i32
    %c0_i32_0 = arith.constant 0 : i32
    %c0_i32_1 = arith.constant 0 : i32
    return %c0_i32, %c0_i32_0 : i32, i32
  }
  func.func @transform_3(%arg0: i32) -> (i32, i32) {
    %c0_i32 = arith.constant 0 : i32
    %c0_i32_0 = arith.constant 0 : i32
    %c0_i32_1 = arith.constant 0 : i32
    return %c0_i32, %c0_i32_0 : i32, i32
  }
  func.func @transform_4(%arg0: i32) -> (i32, i32) {
    %c0_i32 = arith.constant 0 : i32
    %c0_i32_0 = arith.constant 0 : i32
    %c0_i32_1 = arith.constant 0 : i32
    return %c0_i32, %c0_i32_0 : i32, i32
  }
  func.func @transform_5(%arg0: i32) -> (i32, i32) {
    %c0_i32 = arith.constant 0 : i32
    %c0_i32_0 = arith.constant 0 : i32
    %c0_i32_1 = arith.constant 0 : i32
    return %c0_i32, %c0_i32_0 : i32, i32
  }
  func.func @transform_6(%arg0: i32) -> (i32, i32) {
    %c0_i32 = arith.constant 0 : i32
    %c0_i32_0 = arith.constant 0 : i32
    %c0_i32_1 = arith.constant 0 : i32
    return %c0_i32, %c0_i32_0 : i32, i32
  }
  func.func @transform_7(%arg0: i32) -> (i32, i32) {
    %c0_i32 = arith.constant 0 : i32
    %c0_i32_0 = arith.constant 0 : i32
    return %arg0, %c0_i32 : i32, i32
  }
}

module attributes {stable_mosaic.version = 11 : i64} {
  func.func @_tiled_linear_kernel(%arg0: i32, %arg1: i32, %arg2: i32, %arg3: memref<256x128xf32, #tpu.memory_space<vmem>>, %arg4: memref<128x128xf32, #tpu.memory_space<vmem>>, %arg5: memref<1x128xf32, #tpu.memory_space<vmem>>, %arg6: memref<256x128xf32, #tpu.memory_space<vmem>>, %arg7: memref<256x128xf32, #tpu.memory_space<vmem>>) attributes {dimension_semantics = [#tpu.dimension_semantics<parallel>, #tpu.dimension_semantics<parallel>, #tpu.dimension_semantics<arbitrary>], iteration_bounds = array<i64: 1, 1, 1>, scalar_prefetch = 0 : i64, scratch_operands = 1 : i64, tpu.core_type = #tpu.core_type<tc>, window_params = [{transform_indices = @transform_0, window_bounds = array<i64: 256, 128>}, {transform_indices = @transform_1, window_bounds = array<i64: 128, 128>}, {transform_indices = @transform_2, window_bounds = array<i64: 1, 128>}, {transform_indices = @transform_3, window_bounds = array<i64: 256, 128>}]} {
    %c0_i32 = arith.constant 0 : i32
    %0 = arith.cmpi eq, %arg2, %c0_i32 : i32
    %1 = arith.extui %0 : i1 to i32
    %c0_i32_0 = arith.constant 0 : i32
    %2 = arith.cmpi ne, %1, %c0_i32_0 : i32
    scf.if %2 {
      %cst_10 = arith.constant 0.000000e+00 : f32
      %12 = vector.broadcast %cst_10 : f32 to vector<256x128xf32>
      %c0_11 = arith.constant 0 : index
      %c0_12 = arith.constant 0 : index
      %13 = vector.load %arg7[%c0_11, %c0_12] : memref<256x128xf32, #tpu.memory_space<vmem>>, vector<256x128xf32>
      tpu.vector_store %arg7[%c0_11, %c0_12], %12 {strides = array<i32>} : memref<256x128xf32, #tpu.memory_space<vmem>>, vector<256x128xf32>,
    } else {
    }
    %c0 = arith.constant 0 : index
    %c0_1 = arith.constant 0 : index
    %3 = vector.load %arg7[%c0, %c0_1] : memref<256x128xf32, #tpu.memory_space<vmem>>, vector<256x128xf32>
    %c0_2 = arith.constant 0 : index
    %c0_3 = arith.constant 0 : index
    %4 = vector.load %arg3[%c0_2, %c0_3] : memref<256x128xf32, #tpu.memory_space<vmem>>, vector<256x128xf32>
    %c0_4 = arith.constant 0 : index
    %c0_5 = arith.constant 0 : index
    %5 = vector.load %arg4[%c0_4, %c0_5] : memref<128x128xf32, #tpu.memory_space<vmem>>, vector<128x128xf32>
    %cst = arith.constant dense<0.000000e+00> : vector<256x128xf32>
    %6 = tpu.matmul %4, %5, %cst {dimension_numbers = #tpu.dot_dimension_numbers<[1], [0], [0], [1], [0, 0, 1, 1], [], []>} : vector<256x128xf32>, vector<128x128xf32>, vector<256x128xf32> -> vector<256x128xf32>
    %7 = arith.addf %3, %6 : vector<256x128xf32>
    %c0_6 = arith.constant 0 : index
    %c0_7 = arith.constant 0 : index
    %8 = vector.load %arg7[%c0_6, %c0_7] : memref<256x128xf32, #tpu.memory_space<vmem>>, vector<256x128xf32>
    tpu.vector_store %arg7[%c0_6, %c0_7], %7 {strides = array<i32>} : memref<256x128xf32, #tpu.memory_space<vmem>>, vector<256x128xf32>,
    %c0_i32_8 = arith.constant 0 : i32
    %9 = arith.cmpi eq, %arg2, %c0_i32_8 : i32
    %10 = arith.extui %9 : i1 to i32
    %c0_i32_9 = arith.constant 0 : i32
    %11 = arith.cmpi ne, %10, %c0_i32_9 : i32
    scf.if %11 {
      %c0_10 = arith.constant 0 : index
      %c0_11 = arith.constant 0 : index
      %12 = vector.load %arg7[%c0_10, %c0_11] : memref<256x128xf32, #tpu.memory_space<vmem>>, vector<256x128xf32>
      %c0_12 = arith.constant 0 : index
      %c0_13 = arith.constant 0 : index
      %13 = vector.load %arg5[%c0_12, %c0_13] : memref<1x128xf32, #tpu.memory_space<vmem>>, vector<1x128xf32>
      %14 = vector.broadcast %13 : vector<1x128xf32> to vector<256x128xf32>
      %15 = arith.addf %12, %14 : vector<256x128xf32>
      %cst_14 = arith.constant 0.000000e+00 : f32
      %16 = vector.broadcast %cst_14 : f32 to vector<256x128xf32>
      %17 = arith.maximumf %15, %16 : vector<256x128xf32>
      %c0_15 = arith.constant 0 : index
      %c0_16 = arith.constant 0 : index
      %18 = vector.load %arg6[%c0_15, %c0_16] : memref<256x128xf32, #tpu.memory_space<vmem>>, vector<256x128xf32>
      tpu.vector_store %arg6[%c0_15, %c0_16], %17 {strides = array<i32>} : memref<256x128xf32, #tpu.memory_space<vmem>>, vector<256x128xf32>,
    } else {
    }
    return
  }
  func.func @transform_0(%arg0: i32, %arg1: i32, %arg2: i32) -> (i32, i32) {
    %c0_i32 = arith.constant 0 : i32
    return %arg0, %arg2 : i32, i32
  }
  func.func @transform_1(%arg0: i32, %arg1: i32, %arg2: i32) -> (i32, i32) {
    %c0_i32 = arith.constant 0 : i32
    return %arg2, %arg1 : i32, i32
  }
  func.func @transform_2(%arg0: i32, %arg1: i32, %arg2: i32) -> (i32, i32) {
    %c0_i32 = arith.constant 0 : i32
    %c0_i32_0 = arith.constant 0 : i32
    return %c0_i32, %arg1 : i32, i32
  }
  func.func @transform_3(%arg0: i32, %arg1: i32, %arg2: i32) -> (i32, i32) {
    %c0_i32 = arith.constant 0 : i32
    return %arg0, %arg1 : i32, i32
  }
}

</mosaic_0001>

<bundles_post_ra>
// kernel: tpu_custom_call.1
= control target key start
LH: loop header
LB: loop body
LE: loop exit
PB: predicated region body
PF: predicated region fallthrough
CT: control target
= control target key end

     0   :  { %12 = vsyncpa [#allocation3], 0  ;;  %s1614_s0 = inlined_call_operand.hbm [shape: f32[16,128], index: 0, kind: input, shape index: {}]   ;;  %s1615_s1 = inlined_call_operand.hbm [shape: f32[128,128], index: 1, kind: input, shape index: {}]   ;;  %s1616_s2 = inlined_call_operand.vmem [shape: f32[1,128], index: 2, kind: input, shape index: {}]   ;;  %s1617_s3 = inlined_call_operand.hbm [shape: f32[128,128], index: 3, kind: input, shape index: {}]   ;;  %s1618_s4 = inlined_call_operand.vmem [shape: f32[1,128], index: 4, kind: input, shape index: {}]   ;;  %s1619_s5 = inlined_call_operand.hbm [shape: f32[128,128], index: 5, kind: input, shape index: {}]   ;;  %s1620_s6 = inlined_call_operand.vmem [shape: f32[1,128], index: 6, kind: input, shape index: {}]   ;;  %s1621_s7 = inlined_call_operand.hbm [shape: f32[16,128], index: 7, kind: output, shape index: {}]  }
   0x1   :  { %14 = vsyncpa [#allocation3 + $0x1], 0 }
   0x2   :  { %15 = vsyncpa [#allocation6], 0 }
   0x3   :  { %16 = vsyncpa [#allocation9], 0 }
   0x4   :  { %17 = vsyncpa [#allocation4], 0 }
   0x5   :  { %19 = vsyncpa [#allocation4 + $0x1], 0  ;;  %s1305_s24 = smov 0   ;;  %s1307_s25 = smov 0  }
   0x6   :  { %s1309_s26 = smov 0   ;;  %s1311_s27 = smov 0  }
   0x7 LB: > { %s1326_s28 = sadd.s32 4294967295, %s1253_s27   ;;  %s734_s29 = sadd.s32 4294967294, %s1253_s27   ;;  %s1253_s27 = sphi %s1311_s27, %s1647_s27   ;;  %s1249_s26 = sphi %s1309_s26, %s1646_s26   ;;  %s1245_s25 = sphi %s1307_s25, %s1645_s25   ;;  %s1241_s24 = sphi %s1305_s24, %s1644_s24  }
   0x8   : > { %p45_p0 = scmp.ne.s32.totalorder %s1245_s25, %s1241_s24  ;;  %p1622_p1 = scmp.eq.s32.totalorder %s1326_s28, 0 }
   0x9   : > { %p201_p3 = scmp.eq.s32.totalorder %s734_s29, 1  ;;  %p735_p5 = scmp.ge.s32.totalorder %s1253_s27, 1 }
   0xa   : > { %p1335_p4 = por %p1622_p1, %p45_p0  ;;  %p208_p7 = scmp.lt.s32.totalorder %s1253_s27, 3 }
   0xb   : > { %p1340_p6 = por %p201_p3, %p45_p0  ;;  %s1255_s10 = smov [#allocation5]  }
   0xc   : > { %s1626_s30 = scalar_select %p1335_p4, 1, 0 }
   0xd   : > { %s1627_s8 = scalar_select %p1340_p6, 1, 0 }
   0xe   : > { %p1345_p8 = pnand %p735_p5, %p208_p7  ;;  %s220_s11 = sshll.u32 %s1255_s10, 4  ;;  %s1349_s11 = int_to_ptr.vmem [resolvable:$true] %s220_s11 }
   0xf   : > { %1628 = sst [smem:[#allocation15_spill]] %s1627_s8  ;;  %s1256_s13 = smov [#allocation7]  }
  0x10   : > { %s1629_s9 = scalar_select %p1345_p8, 1, 0 }
  0x11   : > { %p999_p9 = pneg %p1345_p8  ;;  %s236_s14 = sshll.u32 %s1256_s13, 4  ;;  %s1360_s14 = int_to_ptr.vmem [resolvable:$true] %s236_s14 }
  0x12   : > { %s1257_s15 = smov [#allocation8]   ;;  %s1065_s19 = scalar_lea.hbm %s1615_s1, 2048 }
  0x13   : > { %p1356_p11 = pnand %p999_p9, %p1622_p1  ;;  %s1362_s16 = sshll.u32 %s1257_s15, 4  ;;  %s253_s16 = int_to_ptr.vmem [resolvable:$true] %s1362_s16 }
  0x14   : > { %p1066_p12 = scmp.ne.s32.totalorder %s1615_s1, %s1065_s19  ;;  %p1072_p5 = scmp.lt.u32.totalorder %s1065_s19, %s1615_s1 }
  0x15   : > { %p1372_p13 = pneg %p1356_p11 }
  0x17   : > { %p1068_p0 = pnand %p1372_p13, %p1066_p12 }
  0x19   : > { %p1069_p3 = pneg %p1068_p0 }
  0x1b   : > { %p1074_p7 = pnand %p1072_p5, %p1069_p3 }
  0x1d   : > { %1077 = shalt.err (!%p1074_p7)
}
  0x1e   : > { %s1078_s10 = scalar_lea.vmem %s1349_s11, 2048  ;;  %p1086_p2 = scmp.lt.s32.totalorder %s1349_s11, %s1349_s11 }
  0x1f   : > { %p1079_p9 = scmp.ne.s32.totalorder %s1349_s11, %s1078_s10  ;;  %p1087_p6 = scmp.lt.s32.totalorder %s1078_s10, %s1078_s10 }
  0x21   : > { %p1081_p10 = pnand %p1079_p9, %p1372_p13  ;;  %p1088_p12 = por %p1087_p6, %p1086_p2 }
  0x23   : > { %p1082_p1 = pneg %p1081_p10 }
  0x25   : > { %p1089_p0 = pnand %p1088_p12, %p1082_p1 }
  0x27   : > { %1092 = shalt.err (!%p1089_p0)
}
  0x28   : > { %s1258_s13 = smov 128   ;;  %s1259_s15 = smov 8  }
  0x29   : > { %1002 = dma.hbm_to_vmem [thread:$0]  (!%p1356_p11), %s1615_s1, 2048, %s1349_s11, [#allocation6], %s1258_s13, %s1258_s13, %s1259_s15  }
  0x2a   : > { %s1093_s21 = scalar_lea.hbm %s1617_s3, 2048 }
  0x2b   : > { %p1094_p1 = scmp.ne.s32.totalorder %s1617_s3, %s1093_s21  ;;  %p1100_p10 = scmp.lt.u32.totalorder %s1093_s21, %s1617_s3 }
  0x2d   : > { %p1096_p2 = pnand %p1094_p1, %p1372_p13 }
  0x2f   : > { %p1097_p6 = pneg %p1096_p2 }
  0x31   : > { %p1102_p3 = pnand %p1100_p10, %p1097_p6 }
  0x33   : > { %1105 = shalt.err (!%p1102_p3)
}
  0x34   : > { %s1106_s11 = scalar_lea.vmem %s1360_s14, 2048  ;;  %p1114_p12 = scmp.lt.s32.totalorder %s1360_s14, %s1360_s14 }
  0x35   : > { %p1107_p5 = scmp.ne.s32.totalorder %s1360_s14, %s1106_s11  ;;  %p1115_p0 = scmp.lt.s32.totalorder %s1106_s11, %s1106_s11 }
  0x37   : > { %p1109_p7 = pnand %p1107_p5, %p1372_p13  ;;  %p1116_p1 = por %p1115_p0, %p1114_p12 }
  0x39   : > { %p1110_p9 = pneg %p1109_p7 }
  0x3b   : > { %p1117_p2 = pnand %p1116_p1, %p1110_p9 }
  0x3d   : > { %1120 = shalt.err (!%p1117_p2)
}
  0x3e   : > { %1005 = dma.hbm_to_vmem [thread:$0]  (!%p1356_p11), %s1617_s3, 2048, %s1360_s14, [#allocation6], %s1258_s13, %s1258_s13, %s1259_s15  }
  0x3f   : > { %s1121_s20 = scalar_lea.hbm %s1619_s5, 2048 }
  0x40   : > { %p1122_p6 = scmp.ne.s32.totalorder %s1619_s5, %s1121_s20  ;;  %p1128_p5 = scmp.lt.u32.totalorder %s1121_s20, %s1619_s5 }
  0x42   : > { %p1124_p10 = pnand %p1122_p6, %p1372_p13 }
  0x44   : > { %p1125_p3 = pneg %p1124_p10 }
  0x46   : > { %p1130_p7 = pnand %p1128_p5, %p1125_p3 }
  0x48   : > { %1133 = shalt.err (!%p1130_p7)
}
  0x49   : > { %s1134_s11 = scalar_lea.vmem %s253_s16, 2048  ;;  %p1142_p1 = scmp.lt.s32.totalorder %s253_s16, %s253_s16 }
  0x4a   : > { %p1135_p9 = scmp.ne.s32.totalorder %s253_s16, %s1134_s11  ;;  %p1143_p2 = scmp.lt.s32.totalorder %s1134_s11, %s1134_s11 }
  0x4c   : > { %p1137_p12 = pnand %p1135_p9, %p1372_p13  ;;  %p1144_p4 = por %p1143_p2, %p1142_p1 }
  0x4e   : > { %p1138_p0 = pneg %p1137_p12 }
  0x50   : > { %p1145_p8 = pnand %p1144_p4, %p1138_p0 }
  0x52   : > { %1148 = shalt.err (!%p1145_p8)
}
  0x53   : > { %1008 = dma.hbm_to_vmem [thread:$0]  (!%p1356_p11), %s1619_s5, 2048, %s253_s16, [#allocation9], %s1258_s13, %s1258_s13, %s1259_s15  }
  0x54   : > { %s1445_s22 = sadd.s32 1, %s1253_s27   ;;  %s32_s17 = sadd.s32 1, %s1249_s26 }
  0x55   : > { %s29_s12 = ssub.s32 %s1253_s27, %s1445_s22  ;;  %p39_p8 = scmp.ne.s32.totalorder %s1249_s26, %s1245_s25 }
  0x56   : > { %p30_p4 = scmp.eq.s32.totalorder %s29_s12, 0  ;;  %p40_p13 = scmp.eq.s32.totalorder %s1253_s27, 0 }
  0x57   : > { %p1020_p6 = scmp.lt.s32.totalorder %s1253_s27, 2  ;;  %p1632_p3 = scmp.eq.s32.totalorder %s1326_s28, 1 }
  0x58   : > { %s1455_s18 = scalar_select %p30_p4, %s1249_s26, %s32_s17  }
  0x59   : > { %p41_p10 = por %p40_p13, %p39_p8  ;;  %p1459_p5 = por %p1632_p3, %p39_p8 }
  0x5a   : > { %s269_s20 = sand.u32 1, %s1249_s26   ;;  %s741_s21 = sshll.u32 %s1253_s27, 7 }
  0x5b   : > { %s740_s16 = sshll.u32 %s269_s20, 3  ;;  %s1468_s23 = scalar_lea.hbm %s1614_s0, %s741_s21 }
  0x5c   : > { %s273_s29 = scalar_lea.vmem [#allocation2], %s740_s16  ;;  %p1470_p11 = pnand %p1020_p6, %p41_p10 }
  0x5d   : > { %s280_s10 = sshll.u32 %s273_s29, 4  ;;  %s270_s14 = scalar_lea.sflag [#allocation3], %s269_s20  ;;  %s1474_s10 = int_to_ptr.vmem [resolvable:$true] %s280_s10 }
  0x5e   : > { %s1149_s8 = scalar_lea.hbm %s1468_s23, 128  ;;  %p1151_p9 = pneg %p1470_p11 }
  0x5f   : > { %p1150_p7 = scmp.ne.s32.totalorder %s1468_s23, %s1149_s8  ;;  %s1154_s21 = scalar_lea.hbm %s1614_s0, 256 }
  0x60   : > { %p1155_p1 = scmp.lt.u32.totalorder %s1468_s23, %s1614_s0  ;;  %p1156_p2 = scmp.lt.u32.totalorder %s1154_s21, %s1149_s8 }
  0x61   : > { %p1152_p12 = pnand %p1151_p9, %p1150_p7  ;;  %p1158_p8 = scmp.lt.u32.totalorder %s1149_s8, %s1468_s23 }
  0x62   : > { %p1157_p4 = por %p1156_p2, %p1155_p1 }
  0x63   : > { %p1153_p0 = pneg %p1152_p12 }
  0x64   : > { %p1159_p13 = por %p1158_p8, %p1157_p4 }
  0x66   : > { %p1160_p6 = pnand %p1159_p13, %p1153_p0 }
  0x68   : > { %1163 = shalt.err (!%p1160_p6)
}
  0x69   : > { %s1164_s20 = scalar_lea.vmem %s1474_s10, 128  ;;  %s1260_s15 = smov [#allocation2]  }
  0x6a   : > { %p1165_p10 = scmp.ne.s32.totalorder %s1474_s10, %s1164_s20  ;;  %s1169_s29 = sshll.u32 %s1260_s15, 4  ;;  %s1170_s29 = int_to_ptr.vmem [resolvable:$false] %s1169_s29 }
  0x6b   : > { %s1171_s12 = scalar_lea.vmem %s1170_s29, 256  ;;  %p1172_p12 = scmp.lt.s32.totalorder %s1474_s10, %s1170_s29 }
  0x6c   : > { %p1167_p3 = pnand %p1165_p10, %p1151_p9  ;;  %p1173_p1 = scmp.lt.s32.totalorder %s1171_s12, %s1164_s20 }
  0x6e   : > { %p1168_p7 = pneg %p1167_p3  ;;  %p1174_p2 = por %p1173_p1, %p1172_p12 }
  0x70   : > { %p1175_p4 = pnand %p1174_p2, %p1168_p7 }
  0x72   : > { %1178 = shalt.err (!%p1175_p4)
}
  0x73   : > { %1012 = dma.hbm_to_vmem [thread:$0]  (!%p1470_p11), %s1468_s23, 128, %s1474_s10, %s270_s14  }
  0x74   : > { %p1635_p0 = scmp.ne.s32.totalorder %s1629_s9, 0 }
  0x75   : > { %s1504_s8 = sand.u32 (!%p1635_p0), 1, %s1245_s25   ;;  %p1636_p9 = scmp.ne.s32.totalorder (!%p1635_p0), %s1626_s30, 0 }
  0x76   : > { %289 = sbr.rel (%p1635_p0) target bundleno = 828 (0x33c), region = 48  ;;  %s743_s17 = sshll.u32 (!%p1635_p0), %s1504_s8, 3 }
  0x77   : > { %s292_s21 = scalar_lea.sflag (!%p1635_p0), [#allocation3], %s1504_s8  ;;  %s1510_s16 = scalar_lea.vmem (!%p1635_p0), [#allocation2], %s743_s17 }
  0x7d   : > { %1224 = dma.done.wait (%p1636_p9), %s292_s21, 128  }
  0x7e   : > { %1226 = vsyncadd (%p1636_p9), %s292_s21, 4294967168  ;;  %p1637_p11 = scmp.eq.s32.totalorder %s1326_s28, 0 }
  0x80   : > { %1228 = dma.done.wait (%p1637_p11), [#allocation6], 4096   ;;  %p1638_p8 = pmov %p1637_p11 }
  0x82   : > { %1230 = vsyncadd (%p1638_p8), [#allocation6], 4294963200  ;;  %p1639_p13 = pmov %p1638_p8 }
  0x83   : > { %p1640_p6 = pmov %p1638_p8 }
  0x84   : > { %1232 = dma.done.wait (%p1639_p13), [#allocation9], 2048  }
  0x85   : > { %1234 = vsyncadd (%p1640_p6), [#allocation9], 4294965248  ;;  %v1261_v0 = vmov 0.0|0.0   ;;  %vm1262_vm0 = vmmov 0   ;;  %v1263_v1 = vmov 0.0   ;;  %v339_v2 = vld [vmem:[#allocation5] sm:$0xff] }
  0x86   : > { %911 = vmatprep.subr.bf16.mxu0 %v1261_v0  ;;  %838 = vmatprep.mubr.msk.f32.mxu0 %vm1262_vm0, %v1263_v1  ;;  %v340_v3 = vld [vmem:[#allocation5 + $0x8] sm:$0xff]  ;;  %v341_v4 = vld [vmem:[#allocation5 + $0x10] sm:$0xff]  ;;  %v342_v6 = vld [vmem:[#allocation5 + $0x18] sm:$0xff]  ;;  %s752_s13 = sshll.u32 %s1326_s28, 7  ;;  %s337_s20 = scalar_lea.vmem [#allocation10], %s743_s17 }
  0x87   : > { %935 = vmatprep.subr.bf16.mxu1 %v1261_v0  ;;  %873 = vmatprep.mubr.msk.f32.mxu1 %vm1262_vm0, %v1263_v1  ;;  %v912_v5 = vpack.c.bf16 %v340_v3, %v339_v2  ;;  %v915_v7 = vpack.c.bf16 %v342_v6, %v341_v4  ;;  %v343_v8 = vld [vmem:[#allocation5 + $0x20] sm:$0xff]  ;;  %v344_v9 = vld [vmem:[#allocation5 + $0x28] sm:$0xff]  ;;  %v435_v12 = vld [vmem:[#allocation7 + $0x10] sm:$0xff]  ;;  %s635_s15 = sshll.u32 %s337_s20, 4  ;;  %s1570_s21 = scalar_lea.hbm %s1621_s7, %s752_s13  ;;  %s1572_s15 = int_to_ptr.vmem [resolvable:$true] %s635_s15 }
  0x88   : > { %v433_v10 = vld [vmem:[#allocation7] sm:$0xff]  ;;  %v434_v11 = vld [vmem:[#allocation7 + $0x8] sm:$0xff]  ;;  %v436_v13 = vld [vmem:[#allocation7 + $0x18] sm:$0xff]  ;;  %v918_v14 = vpack.c.bf16 %v344_v9, %v343_v8  ;;  %s1179_s30 = scalar_lea.vmem %s1572_s15, 128  ;;  %s1264_s28 = smov [#allocation10]  }
  0x89   : > { %913 = vmatpush3.bf16.msra.mxu0 %v912_v5  ;;  %v936_v15 = vpack.c.bf16 %v434_v11, %v433_v10  ;;  %v345_v16 = vld [vmem:[#allocation5 + $0x30] sm:$0xff]  ;;  %v346_v17 = vld [vmem:[#allocation5 + $0x38] sm:$0xff]  ;;  %v939_v18 = vpack.c.bf16 %v436_v13, %v435_v12  ;;  %v437_v19 = vld [vmem:[#allocation7 + $0x20] sm:$0xff]  ;;  %p1180_p10 = scmp.ne.s32.totalorder %s1572_s15, %s1179_s30  ;;  %s1183_s17 = sshll.u32 %s1264_s28, 4  ;;  %s1184_s17 = int_to_ptr.vmem [resolvable:$false] %s1183_s17 }
  0x8a   : > { %914 = vmatprep.subr.bf16.mxu0 %v1261_v0  ;;  %v438_v20 = vld [vmem:[#allocation7 + $0x28] sm:$0xff]  ;;  %v921_v21 = vpack.c.bf16 %v346_v17, %v345_v16  ;;  %v347_v22 = vld [vmem:[#allocation5 + $0x40] sm:$0xff]  ;;  %v439_v25 = vld [vmem:[#allocation7 + $0x30] sm:$0xff]  ;;  %s1185_s9 = scalar_lea.vmem %s1184_s17, 256  ;;  %p1186_p12 = scmp.lt.s32.totalorder %s1572_s15, %s1184_s17 }
  0x8b   : > { %937 = vmatpush3.bf16.msra.mxu1 %v936_v15  ;;  %v348_v23 = vld [vmem:[#allocation5 + $0x48] sm:$0xff]  ;;  %v942_v24 = vpack.c.bf16 %v438_v20, %v437_v19  ;;  %v440_v26 = vld [vmem:[#allocation7 + $0x38] sm:$0xff]  ;;  %v349_v28 = vld [vmem:[#allocation5 + $0x50] sm:$0xff]  ;;  %p1181_p3 = pnand %p1180_p10, %p1459_p5  ;;  %p1187_p1 = scmp.lt.s32.totalorder %s1185_s9, %s1179_s30 }
  0x8c   : > { %938 = vmatprep.subr.bf16.mxu1 %v1261_v0  ;;  %v924_v27 = vpack.c.bf16 %v348_v23, %v347_v22  ;;  %v350_v29 = vld [vmem:[#allocation5 + $0x58] sm:$0xff]  ;;  %v945_v30 = vpack.c.bf16 %v440_v26, %v439_v25  ;;  %v441_v31 = vld [vmem:[#allocation7 + $0x40] sm:$0xff]  ;;  %v442_v32 = vld [vmem:[#allocation7 + $0x48] sm:$0xff] }
  0x8d   : > { %916 = vmatpush3.bf16.msra.mxu0 %v915_v7  ;;  %v927_v33 = vpack.c.bf16 %v350_v29, %v349_v28  ;;  %v351_v34 = vld [vmem:[#allocation5 + $0x60] sm:$0xff]  ;;  %v352_v35 = vld [vmem:[#allocation5 + $0x68] sm:$0xff]  ;;  %v948_v36 = vpack.c.bf16 %v442_v32, %v441_v31  ;;  %v443_v37 = vld [vmem:[#allocation7 + $0x50] sm:$0xff]  ;;  %p1182_p7 = pneg %p1181_p3  ;;  %p1188_p2 = por %p1187_p1, %p1186_p12 }
  0x8e   : > { %917 = vmatprep.subr.bf16.mxu0 %v1261_v0  ;;  %v444_v38 = vld [vmem:[#allocation7 + $0x58] sm:$0xff]  ;;  %v930_v39 = vpack.c.bf16 %v352_v35, %v351_v34  ;;  %v353_v40 = vld [vmem:[#allocation5 + $0x70] sm:$0xff]  ;;  %v445_v43 = vld [vmem:[#allocation7 + $0x60] sm:$0xff] }
  0x8f   : > { %940 = vmatpush3.bf16.msra.mxu1 %v939_v18  ;;  %v354_v41 = vld [vmem:[#allocation5 + $0x78] sm:$0xff]  ;;  %v951_v42 = vpack.c.bf16 %v444_v38, %v443_v37  ;;  %v446_v44 = vld [vmem:[#allocation7 + $0x68] sm:$0xff]  ;;  %v447_v48 = vld [vmem:[#allocation7 + $0x70] sm:$0xff]  ;;  %p1189_p4 = pnand %p1188_p2, %p1182_p7 }
  0x90   : > { %941 = vmatprep.subr.bf16.mxu1 %v1261_v0  ;;  %v933_v45 = vpack.c.bf16 %v354_v41, %v353_v40  ;;  %v954_v46 = vpack.c.bf16 %v446_v44, %v445_v43  ;;  %v338_v47 = vld [vmem:[%s1510_s16] sm:$0xff]  ;;  %v527_v51 = vld [vmem:[#allocation8] sm:$0xff]  ;;  %v528_v52 = vld [vmem:[#allocation8 + $0x8] sm:$0xff]  ;;  %s622_s16 = scalar_lea.sflag [#allocation4], %s1504_s8 }
  0x91   : > { %919 = vmatpush3.bf16.msra.mxu0 %v918_v14  ;;  %v448_v49 = vld [vmem:[#allocation7 + $0x78] sm:$0xff]  ;;  %v529_v53 = vld [vmem:[#allocation8 + $0x10] sm:$0xff]  ;;  %v960_v54 = vpack.c.bf16 %v528_v52, %v527_v51  ;;  %v531_v57 = vld [vmem:[#allocation8 + $0x20] sm:$0xff] }
  0x92   : > { %920 = vmatprep.subr.bf16.mxu0 %v1261_v0  ;;  %v957_v50 = vpack.c.bf16 %v448_v49, %v447_v48  ;;  %v530_v55 = vld [vmem:[#allocation8 + $0x18] sm:$0xff]  ;;  %v532_v58 = vld [vmem:[#allocation8 + $0x28] sm:$0xff]  ;;  %v533_v60 = vld [vmem:[#allocation8 + $0x30] sm:$0xff] }
  0x93   : > { %943 = vmatpush3.bf16.msra.mxu1 %v942_v24  ;;  %v963_v56 = vpack.c.bf16 %v530_v55, %v529_v53  ;;  %v966_v59 = vpack.c.bf16 %v532_v58, %v531_v57  ;;  %v534_v61 = vld [vmem:[#allocation8 + $0x38] sm:$0xff]  ;;  %v535_v63 = vld [vmem:[#allocation8 + $0x40] sm:$0xff]  ;;  %v537_v3 = vld [vmem:[#allocation8 + $0x50] sm:$0xff] }
  0x94   : > { %944 = vmatprep.subr.bf16.mxu1 %v1261_v0  ;;  %v969_v62 = vpack.c.bf16 %v534_v61, %v533_v60  ;;  %v538_v4 = vld [vmem:[#allocation8 + $0x58] sm:$0xff]  ;;  %v539_v6 = vld [vmem:[#allocation8 + $0x60] sm:$0xff]  ;;  %v540_v7 = vld [vmem:[#allocation8 + $0x68] sm:$0xff] }
  0x95   : > { %922 = vmatpush3.bf16.msra.mxu0 %v921_v21  ;;  %v975_v5 = vpack.c.bf16 %v538_v4, %v537_v3  ;;  %v978_v8 = vpack.c.bf16 %v540_v7, %v539_v6  ;;  %v748_v9 = vld [vmem:[%s1616_s2] ss:$0 sm:$0xff]  ;;  %v542_v15 = vld [vmem:[#allocation8 + $0x78] sm:$0xff] }
  0x96   : > { %923 = vmatprep.subr.bf16.mxu0 %v1261_v0  ;;  %v541_v14 = vld [vmem:[#allocation8 + $0x70] sm:$0xff] }
  0x97   : > { %946 = vmatpush3.bf16.msra.mxu1 %v945_v30  ;;  %v981_v16 = vpack.c.bf16 %v542_v15, %v541_v14  ;;  %v749_v17 = vld [vmem:[%s1618_s4] ss:$0 sm:$0xff] }
  0x98   : > { %947 = vmatprep.subr.bf16.mxu1 %v1261_v0  ;;  %v750_v21 = vld [vmem:[%s1620_s6] ss:$0 sm:$0xff] }
  0x99   : > { %925 = vmatpush3.bf16.msra.mxu0 %v924_v27 }
  0x9a   : > { %926 = vmatprep.subr.bf16.mxu0 %v1261_v0 }
  0x9b   : > { %949 = vmatpush3.bf16.msra.mxu1 %v948_v36 }
  0x9c   : > { %950 = vmatprep.subr.bf16.mxu1 %v1261_v0 }
  0x9d   : > { %928 = vmatpush3.bf16.msra.mxu0 %v927_v33 }
  0x9e   : > { %929 = vmatprep.subr.bf16.mxu0 %v1261_v0 }
  0x9f   : > { %952 = vmatpush3.bf16.msra.mxu1 %v951_v42 }
  0xa0   : > { %953 = vmatprep.subr.bf16.mxu1 %v1261_v0 }
  0xa1   : > { %931 = vmatpush3.bf16.msra.mxu0 %v930_v39 }
  0xa2   : > { %932 = vmatprep.subr.bf16.mxu0 %v1261_v0 }
  0xa3   : > { %955 = vmatpush3.bf16.msra.mxu1 %v954_v46 }
  0xa4   : > { %956 = vmatprep.subr.bf16.mxu1 %v1261_v0 }
  0xa5   : > { %934 = vmatpush3.bf16.msra.mxu0 %v933_v45 }
  0xa6   : > { %959 = vmatprep.subr.bf16.mxu0 %v1261_v0 }
  0xa7   : > { %958 = vmatpush3.bf16.msra.mxu1 %v957_v50 }
  0xa8   : > { %839 = vmatmul.mubr.f32.vlgmr.msra.gmra.mrb[0].mxu0 %v338_v47 }
  0xa9   : > { %908 = vmatprep.mubr.msk.f32.mxu0 %vm1262_vm0, %v1263_v1  ;;  %961 = vmatpush3.bf16.msra.mxu0 %v960_v54  ;;  %v536_v1 = vld [vmem:[#allocation8 + $0x48] sm:$0xff] }
  0xaa   : > { %962 = vmatprep.subr.bf16.mxu0 %v1261_v0  ;;  %v972_v2 = vpack.c.bf16 %v536_v1, %v535_v63 }
  0xad   : > { %964 = vmatpush3.bf16.msra.mxu0 %v963_v56 }
  0xae   : > { %965 = vmatprep.subr.bf16.mxu0 %v1261_v0 }
  0xb1   : > { %967 = vmatpush3.bf16.msra.mxu0 %v966_v59 }
  0xb2   : > { %968 = vmatprep.subr.bf16.mxu0 %v1261_v0 }
  0xb5   : > { %970 = vmatpush3.bf16.msra.mxu0 %v969_v62 }
  0xb6   : > { %971 = vmatprep.subr.bf16.mxu0 %v1261_v0 }
  0xb9   : > { %973 = vmatpush3.bf16.msra.mxu0 %v972_v2 }
  0xba   : > { %974 = vmatprep.subr.bf16.mxu0 %v1261_v0 }
  0xbd   : > { %976 = vmatpush3.bf16.msra.mxu0 %v975_v5 }
  0xbe   : > { %977 = vmatprep.subr.bf16.mxu0 %v1261_v0 }
  0xc1   : > { %979 = vmatpush3.bf16.msra.mxu0 %v978_v8 }
  0xc2   : > { %980 = vmatprep.subr.bf16.mxu0 %v1261_v0 }
  0xc5   : > { %982 = vmatpush3.bf16.msra.mxu0 %v981_v16 }
 0x17b   : > { %v428_v10 = vpop.f32.mrb[0].mxu0 }
 0x17c   : > { %v429_v11 = vadd.f32 %v748_v9, %v428_v10  ;;  %v840_v12 = vpop.f32.mrb[1].mxu0 }
 0x17e   : > { %v432_v13 = vmax.f32 %v429_v11, 0.0 }
 0x180   : > { %874 = vmatmul.mubr.f32.vlgmr.msra.gmra.mrb[0].mxu1 %v432_v13 }
 0x253   : > { %v522_v0 = vpop.f32.mrb[0].mxu1 }
 0x254   : > { %v523_v18 = vadd.f32 %v749_v17, %v522_v0  ;;  %v875_v19 = vpop.f32.mrb[1].mxu1 }
 0x256   : > { %v526_v20 = vmax.f32 %v523_v18, 0.0 }
 0x258   : > { %909 = vmatmul.mubr.f32.vlgmr.msra.gmra.mrb[2].mxu0 %v526_v20 }
 0x32b   : > { %v616_v22 = vpop.f32.mrb[2].mxu0 }
 0x32c   : > { %v617_v23 = vadd.f32 %v750_v21, %v616_v22  ;;  %v910_v24 = vpop.f32.mrb[3].mxu0 }
 0x32e   : > { %620 = vst [vmem:[%s337_s20] sm:$0xff] %v617_v23 }
 0x32f   : > { %1192 = shalt.err (!%p1189_p4)
}
 0x330   : > { %s1193_s8 = scalar_lea.hbm %s1570_s21, 128  ;;  %s1197_s11 = scalar_lea.hbm %s1621_s7, 256 }
 0x331   : > { %p1194_p0 = scmp.ne.s32.totalorder %s1570_s21, %s1193_s8  ;;  %p1198_p8 = scmp.lt.u32.totalorder %s1570_s21, %s1621_s7 }
 0x332   : > { %p1199_p13 = scmp.lt.u32.totalorder %s1197_s11, %s1193_s8  ;;  %p1201_p10 = scmp.lt.u32.totalorder %s1193_s8, %s1570_s21 }
 0x333   : > { %p1195_p9 = pnand %p1194_p0, %p1459_p5 }
 0x334   : > { %p1200_p6 = por %p1199_p13, %p1198_p8 }
 0x335   : > { %p1196_p11 = pneg %p1195_p9 }
 0x336   : > { %p1202_p3 = por %p1201_p10, %p1200_p6 }
 0x338   : > { %p1203_p7 = pnand %p1202_p3, %p1196_p11 }
 0x33a   : > { %1206 = shalt.err (!%p1203_p7)
}
 0x33b   : > { %997 = dma.vmem_to_hbm [thread:$0]  (%p1459_p5), %s1572_s15, 128, %s1570_s21, %s622_s16  }
 0x33c PF: > { %s1641_s20 = sld [smem:[#allocation15_spill]]  ;;  %s647_s29 = sand.u32 1, %s1241_s24  }
 0x33d   : > { %p1643_p1 = scmp.ge.s32.totalorder %s1253_s27, 2  ;;  %s648_s12 = scalar_lea.sflag [#allocation4], %s647_s29 }
 0x342   : > { %p1642_p12 = scmp.ne.s32.totalorder %s1641_s20, 0 }
 0x344   : > { %p1014_p2 = pnand %p1643_p1, %p1642_p12 }
 0x346   : > { %1236 = dma.done.wait (!%p1014_p2), %s648_s12, 128  }
 0x347   : > { %1238 = vsyncadd (!%p1014_p2), %s648_s12, 4294967168  ;;  %p22_p4 = scmp.ge.s32.totalorder %s1445_s22, 4   ;;  %s1644_s24 = smov %s1245_s25 }
 0x348   : > { %s1645_s25 = smov %s1249_s26  ;;  %s1646_s26 = smov %s1455_s18 }
 0x349   : > { %s1647_s27 = smov %s1445_s22  ;;  %24 = sbr.rel (!%p22_p4) target bundleno = 7 (0x7), region = 105 }
 0x350   :  { %653 = vsyncpa [#allocation3], 1 }
 0x351   :  { %655 = vsyncpa [#allocation3 + $0x1], 1 }
 0x352   :  { %656 = vsyncpa [#allocation6], 1 }
 0x353   :  { %657 = vsyncpa [#allocation9], 1 }
 0x354   :  { %658 = vsyncpa [#allocation4], 1 }
 0x355   :  { %660 = vsyncpa [#allocation4 + $0x1], 1 }

// kernel: tpu_custom_call.1
= control target key start
LH: loop header
LB: loop body
LE: loop exit
PB: predicated region body
PF: predicated region fallthrough
CT: control target
= control target key end

     0   :  { %12 = vsyncpa [#allocation3], 0  ;;  %s1614_s0 = inlined_call_operand.hbm [shape: f32[16,128], index: 0, kind: input, shape index: {}]   ;;  %s1615_s1 = inlined_call_operand.hbm [shape: f32[128,128], index: 1, kind: input, shape index: {}]   ;;  %s1616_s2 = inlined_call_operand.vmem [shape: f32[1,128], index: 2, kind: input, shape index: {}]   ;;  %s1617_s3 = inlined_call_operand.hbm [shape: f32[128,128], index: 3, kind: input, shape index: {}]   ;;  %s1618_s4 = inlined_call_operand.vmem [shape: f32[1,128], index: 4, kind: input, shape index: {}]   ;;  %s1619_s5 = inlined_call_operand.hbm [shape: f32[128,128], index: 5, kind: input, shape index: {}]   ;;  %s1620_s6 = inlined_call_operand.vmem [shape: f32[1,128], index: 6, kind: input, shape index: {}]   ;;  %s1621_s7 = inlined_call_operand.hbm [shape: f32[16,128], index: 7, kind: output, shape index: {}]  }
   0x1   :  { %14 = vsyncpa [#allocation3 + $0x1], 0 }
   0x2   :  { %15 = vsyncpa [#allocation6], 0 }
   0x3   :  { %16 = vsyncpa [#allocation9], 0 }
   0x4   :  { %17 = vsyncpa [#allocation4], 0 }
   0x5   :  { %19 = vsyncpa [#allocation4 + $0x1], 0  ;;  %s1305_s24 = smov 0   ;;  %s1307_s25 = smov 0  }
   0x6   :  { %s1309_s26 = smov 0   ;;  %s1311_s27 = smov 0  }
   0x7 LB: > { %s1326_s28 = sadd.s32 4294967295, %s1253_s27   ;;  %s734_s29 = sadd.s32 4294967294, %s1253_s27   ;;  %s1253_s27 = sphi %s1311_s27, %s1647_s27   ;;  %s1249_s26 = sphi %s1309_s26, %s1646_s26   ;;  %s1245_s25 = sphi %s1307_s25, %s1645_s25   ;;  %s1241_s24 = sphi %s1305_s24, %s1644_s24  }
   0x8   : > { %p45_p0 = scmp.ne.s32.totalorder %s1245_s25, %s1241_s24  ;;  %p1622_p1 = scmp.eq.s32.totalorder %s1326_s28, 0 }
   0x9   : > { %p201_p3 = scmp.eq.s32.totalorder %s734_s29, 1  ;;  %p735_p5 = scmp.ge.s32.totalorder %s1253_s27, 1 }
   0xa   : > { %p1335_p4 = por %p1622_p1, %p45_p0  ;;  %p208_p7 = scmp.lt.s32.totalorder %s1253_s27, 3 }
   0xb   : > { %p1340_p6 = por %p201_p3, %p45_p0  ;;  %s1255_s10 = smov [#allocation5]  }
   0xc   : > { %s1626_s30 = scalar_select %p1335_p4, 1, 0 }
   0xd   : > { %s1627_s8 = scalar_select %p1340_p6, 1, 0 }
   0xe   : > { %p1345_p8 = pnand %p735_p5, %p208_p7  ;;  %s220_s11 = sshll.u32 %s1255_s10, 4  ;;  %s1349_s11 = int_to_ptr.vmem [resolvable:$true] %s220_s11 }
   0xf   : > { %1628 = sst [smem:[#allocation15_spill]] %s1627_s8  ;;  %s1256_s13 = smov [#allocation7]  }
  0x10   : > { %s1629_s9 = scalar_select %p1345_p8, 1, 0 }
  0x11   : > { %p999_p9 = pneg %p1345_p8  ;;  %s236_s14 = sshll.u32 %s1256_s13, 4  ;;  %s1360_s14 = int_to_ptr.vmem [resolvable:$true] %s236_s14 }
  0x12   : > { %s1257_s15 = smov [#allocation8]   ;;  %s1065_s19 = scalar_lea.hbm %s1615_s1, 2048 }
  0x13   : > { %p1356_p11 = pnand %p999_p9, %p1622_p1  ;;  %s1362_s16 = sshll.u32 %s1257_s15, 4  ;;  %s253_s16 = int_to_ptr.vmem [resolvable:$true] %s1362_s16 }
  0x14   : > { %p1066_p12 = scmp.ne.s32.totalorder %s1615_s1, %s1065_s19  ;;  %p1072_p5 = scmp.lt.u32.totalorder %s1065_s19, %s1615_s1 }
  0x15   : > { %p1372_p13 = pneg %p1356_p11 }
  0x17   : > { %p1068_p0 = pnand %p1372_p13, %p1066_p12 }
  0x19   : > { %p1069_p3 = pneg %p1068_p0 }
  0x1b   : > { %p1074_p7 = pnand %p1072_p5, %p1069_p3 }
  0x1d   : > { %1077 = shalt.err (!%p1074_p7)
}
  0x1e   : > { %s1078_s10 = scalar_lea.vmem %s1349_s11, 2048  ;;  %p1086_p2 = scmp.lt.s32.totalorder %s1349_s11, %s1349_s11 }
  0x1f   : > { %p1079_p9 = scmp.ne.s32.totalorder %s1349_s11, %s1078_s10  ;;  %p1087_p6 = scmp.lt.s32.totalorder %s1078_s10, %s1078_s10 }
  0x21   : > { %p1081_p10 = pnand %p1079_p9, %p1372_p13  ;;  %p1088_p12 = por %p1087_p6, %p1086_p2 }
  0x23   : > { %p1082_p1 = pneg %p1081_p10 }
  0x25   : > { %p1089_p0 = pnand %p1088_p12, %p1082_p1 }
  0x27   : > { %1092 = shalt.err (!%p1089_p0)
}
  0x28   : > { %s1258_s13 = smov 128   ;;  %s1259_s15 = smov 8  }
  0x29   : > { %1002 = dma.hbm_to_vmem [thread:$0]  (!%p1356_p11), %s1615_s1, 2048, %s1349_s11, [#allocation6], %s1258_s13, %s1258_s13, %s1259_s15  }
  0x2a   : > { %s1093_s21 = scalar_lea.hbm %s1617_s3, 2048 }
  0x2b   : > { %p1094_p1 = scmp.ne.s32.totalorder %s1617_s3, %s1093_s21  ;;  %p1100_p10 = scmp.lt.u32.totalorder %s1093_s21, %s1617_s3 }
  0x2d   : > { %p1096_p2 = pnand %p1094_p1, %p1372_p13 }
  0x2f   : > { %p1097_p6 = pneg %p1096_p2 }
  0x31   : > { %p1102_p3 = pnand %p1100_p10, %p1097_p6 }
  0x33   : > { %1105 = shalt.err (!%p1102_p3)
}
  0x34   : > { %s1106_s11 = scalar_lea.vmem %s1360_s14, 2048  ;;  %p1114_p12 = scmp.lt.s32.totalorder %s1360_s14, %s1360_s14 }
  0x35   : > { %p1107_p5 = scmp.ne.s32.totalorder %s1360_s14, %s1106_s11  ;;  %p1115_p0 = scmp.lt.s32.totalorder %s1106_s11, %s1106_s11 }
  0x37   : > { %p1109_p7 = pnand %p1107_p5, %p1372_p13  ;;  %p1116_p1 = por %p1115_p0, %p1114_p12 }
  0x39   : > { %p1110_p9 = pneg %p1109_p7 }
  0x3b   : > { %p1117_p2 = pnand %p1116_p1, %p1110_p9 }
  0x3d   : > { %1120 = shalt.err (!%p1117_p2)
}
  0x3e   : > { %1005 = dma.hbm_to_vmem [thread:$0]  (!%p1356_p11), %s1617_s3, 2048, %s1360_s14, [#allocation6], %s1258_s13, %s1258_s13, %s1259_s15  }
  0x3f   : > { %s1121_s20 = scalar_lea.hbm %s1619_s5, 2048 }
  0x40   : > { %p1122_p6 = scmp.ne.s32.totalorder %s1619_s5, %s1121_s20  ;;  %p1128_p5 = scmp.lt.u32.totalorder %s1121_s20, %s1619_s5 }
  0x42   : > { %p1124_p10 = pnand %p1122_p6, %p1372_p13 }
  0x44   : > { %p1125_p3 = pneg %p1124_p10 }
  0x46   : > { %p1130_p7 = pnand %p1128_p5, %p1125_p3 }
  0x48   : > { %1133 = shalt.err (!%p1130_p7)
}
  0x49   : > { %s1134_s11 = scalar_lea.vmem %s253_s16, 2048  ;;  %p1142_p1 = scmp.lt.s32.totalorder %s253_s16, %s253_s16 }
  0x4a   : > { %p1135_p9 = scmp.ne.s32.totalorder %s253_s16, %s1134_s11  ;;  %p1143_p2 = scmp.lt.s32.totalorder %s1134_s11, %s1134_s11 }
  0x4c   : > { %p1137_p12 = pnand %p1135_p9, %p1372_p13  ;;  %p1144_p4 = por %p1143_p2, %p1142_p1 }
  0x4e   : > { %p1138_p0 = pneg %p1137_p12 }
  0x50   : > { %p1145_p8 = pnand %p1144_p4, %p1138_p0 }
  0x52   : > { %1148 = shalt.err (!%p1145_p8)
}
  0x53   : > { %1008 = dma.hbm_to_vmem [thread:$0]  (!%p1356_p11), %s1619_s5, 2048, %s253_s16, [#allocation9], %s1258_s13, %s1258_s13, %s1259_s15  }
  0x54   : > { %s1445_s22 = sadd.s32 1, %s1253_s27   ;;  %s32_s17 = sadd.s32 1, %s1249_s26 }
  0x55   : > { %s29_s12 = ssub.s32 %s1253_s27, %s1445_s22  ;;  %p39_p8 = scmp.ne.s32.totalorder %s1249_s26, %s1245_s25 }
  0x56   : > { %p30_p4 = scmp.eq.s32.totalorder %s29_s12, 0  ;;  %p40_p13 = scmp.eq.s32.totalorder %s1253_s27, 0 }
  0x57   : > { %p1020_p6 = scmp.lt.s32.totalorder %s1253_s27, 2  ;;  %p1632_p3 = scmp.eq.s32.totalorder %s1326_s28, 1 }
  0x58   : > { %s1455_s18 = scalar_select %p30_p4, %s1249_s26, %s32_s17  }
  0x59   : > { %p41_p10 = por %p40_p13, %p39_p8  ;;  %p1459_p5 = por %p1632_p3, %p39_p8 }
  0x5a   : > { %s269_s20 = sand.u32 1, %s1249_s26   ;;  %s741_s21 = sshll.u32 %s1253_s27, 7 }
  0x5b   : > { %s740_s16 = sshll.u32 %s269_s20, 3  ;;  %s1468_s23 = scalar_lea.hbm %s1614_s0, %s741_s21 }
  0x5c   : > { %s273_s29 = scalar_lea.vmem [#allocation2], %s740_s16  ;;  %p1470_p11 = pnand %p1020_p6, %p41_p10 }
  0x5d   : > { %s280_s10 = sshll.u32 %s273_s29, 4  ;;  %s270_s14 = scalar_lea.sflag [#allocation3], %s269_s20  ;;  %s1474_s10 = int_to_ptr.vmem [resolvable:$true] %s280_s10 }
  0x5e   : > { %s1149_s8 = scalar_lea.hbm %s1468_s23, 128  ;;  %p1151_p9 = pneg %p1470_p11 }
  0x5f   : > { %p1150_p7 = scmp.ne.s32.totalorder %s1468_s23, %s1149_s8  ;;  %s1154_s21 = scalar_lea.hbm %s1614_s0, 256 }
  0x60   : > { %p1155_p1 = scmp.lt.u32.totalorder %s1468_s23, %s1614_s0  ;;  %p1156_p2 = scmp.lt.u32.totalorder %s1154_s21, %s1149_s8 }
  0x61   : > { %p1152_p12 = pnand %p1151_p9, %p1150_p7  ;;  %p1158_p8 = scmp.lt.u32.totalorder %s1149_s8, %s1468_s23 }
  0x62   : > { %p1157_p4 = por %p1156_p2, %p1155_p1 }
  0x63   : > { %p1153_p0 = pneg %p1152_p12 }
  0x64   : > { %p1159_p13 = por %p1158_p8, %p1157_p4 }
  0x66   : > { %p1160_p6 = pnand %p1159_p13, %p1153_p0 }
  0x68   : > { %1163 = shalt.err (!%p1160_p6)
}
  0x69   : > { %s1164_s20 = scalar_lea.vmem %s1474_s10, 128  ;;  %s1260_s15 = smov [#allocation2]  }
  0x6a   : > { %p1165_p10 = scmp.ne.s32.totalorder %s1474_s10, %s1164_s20  ;;  %s1169_s29 = sshll.u32 %s1260_s15, 4  ;;  %s1170_s29 = int_to_ptr.vmem [resolvable:$false] %s1169_s29 }
  0x6b   : > { %s1171_s12 = scalar_lea.vmem %s1170_s29, 256  ;;  %p1172_p12 = scmp.lt.s32.totalorder %s1474_s10, %s1170_s29 }
  0x6c   : > { %p1167_p3 = pnand %p1165_p10, %p1151_p9  ;;  %p1173_p1 = scmp.lt.s32.totalorder %s1171_s12, %s1164_s20 }
  0x6e   : > { %p1168_p7 = pneg %p1167_p3  ;;  %p1174_p2 = por %p1173_p1, %p1172_p12 }
  0x70   : > { %p1175_p4 = pnand %p1174_p2, %p1168_p7 }
  0x72   : > { %1178 = shalt.err (!%p1175_p4)
}
  0x73   : > { %1012 = dma.hbm_to_vmem [thread:$0]  (!%p1470_p11), %s1468_s23, 128, %s1474_s10, %s270_s14  }
  0x74   : > { %p1635_p0 = scmp.ne.s32.totalorder %s1629_s9, 0 }
  0x75   : > { %s1504_s8 = sand.u32 (!%p1635_p0), 1, %s1245_s25   ;;  %p1636_p9 = scmp.ne.s32.totalorder (!%p1635_p0), %s1626_s30, 0 }
  0x76   : > { %289 = sbr.rel (%p1635_p0) target bundleno = 828 (0x33c), region = 48  ;;  %s743_s17 = sshll.u32 (!%p1635_p0), %s1504_s8, 3 }
  0x77   : > { %s292_s21 = scalar_lea.sflag (!%p1635_p0), [#allocation3], %s1504_s8  ;;  %s1510_s16 = scalar_lea.vmem (!%p1635_p0), [#allocation2], %s743_s17 }
  0x7d   : > { %1224 = dma.done.wait (%p1636_p9), %s292_s21, 128  }
  0x7e   : > { %1226 = vsyncadd (%p1636_p9), %s292_s21, 4294967168  ;;  %p1637_p11 = scmp.eq.s32.totalorder %s1326_s28, 0 }
  0x80   : > { %1228 = dma.done.wait (%p1637_p11), [#allocation6], 4096   ;;  %p1638_p8 = pmov %p1637_p11 }
  0x82   : > { %1230 = vsyncadd (%p1638_p8), [#allocation6], 4294963200  ;;  %p1639_p13 = pmov %p1638_p8 }
  0x83   : > { %p1640_p6 = pmov %p1638_p8 }
  0x84   : > { %1232 = dma.done.wait (%p1639_p13), [#allocation9], 2048  }
  0x85   : > { %1234 = vsyncadd (%p1640_p6), [#allocation9], 4294965248  ;;  %v1261_v0 = vmov 0.0|0.0   ;;  %vm1262_vm0 = vmmov 0   ;;  %v1263_v1 = vmov 0.0   ;;  %v339_v2 = vld [vmem:[#allocation5] sm:$0xff] }
  0x86   : > { %911 = vmatprep.subr.bf16.mxu0 %v1261_v0  ;;  %838 = vmatprep.mubr.msk.f32.mxu0 %vm1262_vm0, %v1263_v1  ;;  %v340_v3 = vld [vmem:[#allocation5 + $0x8] sm:$0xff]  ;;  %v341_v4 = vld [vmem:[#allocation5 + $0x10] sm:$0xff]  ;;  %v342_v6 = vld [vmem:[#allocation5 + $0x18] sm:$0xff]  ;;  %s752_s13 = sshll.u32 %s1326_s28, 7  ;;  %s337_s20 = scalar_lea.vmem [#allocation10], %s743_s17 }
  0x87   : > { %935 = vmatprep.subr.bf16.mxu1 %v1261_v0  ;;  %873 = vmatprep.mubr.msk.f32.mxu1 %vm1262_vm0, %v1263_v1  ;;  %v912_v5 = vpack.c.bf16 %v340_v3, %v339_v2  ;;  %v915_v7 = vpack.c.bf16 %v342_v6, %v341_v4  ;;  %v343_v8 = vld [vmem:[#allocation5 + $0x20] sm:$0xff]  ;;  %v344_v9 = vld [vmem:[#allocation5 + $0x28] sm:$0xff]  ;;  %v435_v12 = vld [vmem:[#allocation7 + $0x10] sm:$0xff]  ;;  %s635_s15 = sshll.u32 %s337_s20, 4  ;;  %s1570_s21 = scalar_lea.hbm %s1621_s7, %s752_s13  ;;  %s1572_s15 = int_to_ptr.vmem [resolvable:$true] %s635_s15 }
  0x88   : > { %v433_v10 = vld [vmem:[#allocation7] sm:$0xff]  ;;  %v434_v11 = vld [vmem:[#allocation7 + $0x8] sm:$0xff]  ;;  %v436_v13 = vld [vmem:[#allocation7 + $0x18] sm:$0xff]  ;;  %v918_v14 = vpack.c.bf16 %v344_v9, %v343_v8  ;;  %s1179_s30 = scalar_lea.vmem %s1572_s15, 128  ;;  %s1264_s28 = smov [#allocation10]  }
  0x89   : > { %913 = vmatpush3.bf16.msra.mxu0 %v912_v5  ;;  %v936_v15 = vpack.c.bf16 %v434_v11, %v433_v10  ;;  %v345_v16 = vld [vmem:[#allocation5 + $0x30] sm:$0xff]  ;;  %v346_v17 = vld [vmem:[#allocation5 + $0x38] sm:$0xff]  ;;  %v939_v18 = vpack.c.bf16 %v436_v13, %v435_v12  ;;  %v437_v19 = vld [vmem:[#allocation7 + $0x20] sm:$0xff]  ;;  %p1180_p10 = scmp.ne.s32.totalorder %s1572_s15, %s1179_s30  ;;  %s1183_s17 = sshll.u32 %s1264_s28, 4  ;;  %s1184_s17 = int_to_ptr.vmem [resolvable:$false] %s1183_s17 }
  0x8a   : > { %914 = vmatprep.subr.bf16.mxu0 %v1261_v0  ;;  %v438_v20 = vld [vmem:[#allocation7 + $0x28] sm:$0xff]  ;;  %v921_v21 = vpack.c.bf16 %v346_v17, %v345_v16  ;;  %v347_v22 = vld [vmem:[#allocation5 + $0x40] sm:$0xff]  ;;  %v439_v25 = vld [vmem:[#allocation7 + $0x30] sm:$0xff]  ;;  %s1185_s9 = scalar_lea.vmem %s1184_s17, 256  ;;  %p1186_p12 = scmp.lt.s32.totalorder %s1572_s15, %s1184_s17 }
  0x8b   : > { %937 = vmatpush3.bf16.msra.mxu1 %v936_v15  ;;  %v348_v23 = vld [vmem:[#allocation5 + $0x48] sm:$0xff]  ;;  %v942_v24 = vpack.c.bf16 %v438_v20, %v437_v19  ;;  %v440_v26 = vld [vmem:[#allocation7 + $0x38] sm:$0xff]  ;;  %v349_v28 = vld [vmem:[#allocation5 + $0x50] sm:$0xff]  ;;  %p1181_p3 = pnand %p1180_p10, %p1459_p5  ;;  %p1187_p1 = scmp.lt.s32.totalorder %s1185_s9, %s1179_s30 }
  0x8c   : > { %938 = vmatprep.subr.bf16.mxu1 %v1261_v0  ;;  %v924_v27 = vpack.c.bf16 %v348_v23, %v347_v22  ;;  %v350_v29 = vld [vmem:[#allocation5 + $0x58] sm:$0xff]  ;;  %v945_v30 = vpack.c.bf16 %v440_v26, %v439_v25  ;;  %v441_v31 = vld [vmem:[#allocation7 + $0x40] sm:$0xff]  ;;  %v442_v32 = vld [vmem:[#allocation7 + $0x48] sm:$0xff] }
  0x8d   : > { %916 = vmatpush3.bf16.msra.mxu0 %v915_v7  ;;  %v927_v33 = vpack.c.bf16 %v350_v29, %v349_v28  ;;  %v351_v34 = vld [vmem:[#allocation5 + $0x60] sm:$0xff]  ;;  %v352_v35 = vld [vmem:[#allocation5 + $0x68] sm:$0xff]  ;;  %v948_v36 = vpack.c.bf16 %v442_v32, %v441_v31  ;;  %v443_v37 = vld [vmem:[#allocation7 + $0x50] sm:$0xff]  ;;  %p1182_p7 = pneg %p1181_p3  ;;  %p1188_p2 = por %p1187_p1, %p1186_p12 }
  0x8e   : > { %917 = vmatprep.subr.bf16.mxu0 %v1261_v0  ;;  %v444_v38 = vld [vmem:[#allocation7 + $0x58] sm:$0xff]  ;;  %v930_v39 = vpack.c.bf16 %v352_v35, %v351_v34  ;;  %v353_v40 = vld [vmem:[#allocation5 + $0x70] sm:$0xff]  ;;  %v445_v43 = vld [vmem:[#allocation7 + $0x60] sm:$0xff] }
  0x8f   : > { %940 = vmatpush3.bf16.msra.mxu1 %v939_v18  ;;  %v354_v41 = vld [vmem:[#allocation5 + $0x78] sm:$0xff]  ;;  %v951_v42 = vpack.c.bf16 %v444_v38, %v443_v37  ;;  %v446_v44 = vld [vmem:[#allocation7 + $0x68] sm:$0xff]  ;;  %v447_v48 = vld [vmem:[#allocation7 + $0x70] sm:$0xff]  ;;  %p1189_p4 = pnand %p1188_p2, %p1182_p7 }
  0x90   : > { %941 = vmatprep.subr.bf16.mxu1 %v1261_v0  ;;  %v933_v45 = vpack.c.bf16 %v354_v41, %v353_v40  ;;  %v954_v46 = vpack.c.bf16 %v446_v44, %v445_v43  ;;  %v338_v47 = vld [vmem:[%s1510_s16] sm:$0xff]  ;;  %v527_v51 = vld [vmem:[#allocation8] sm:$0xff]  ;;  %v528_v52 = vld [vmem:[#allocation8 + $0x8] sm:$0xff]  ;;  %s622_s16 = scalar_lea.sflag [#allocation4], %s1504_s8 }
  0x91   : > { %919 = vmatpush3.bf16.msra.mxu0 %v918_v14  ;;  %v448_v49 = vld [vmem:[#allocation7 + $0x78] sm:$0xff]  ;;  %v529_v53 = vld [vmem:[#allocation8 + $0x10] sm:$0xff]  ;;  %v960_v54 = vpack.c.bf16 %v528_v52, %v527_v51  ;;  %v531_v57 = vld [vmem:[#allocation8 + $0x20] sm:$0xff] }
  0x92   : > { %920 = vmatprep.subr.bf16.mxu0 %v1261_v0  ;;  %v957_v50 = vpack.c.bf16 %v448_v49, %v447_v48  ;;  %v530_v55 = vld [vmem:[#allocation8 + $0x18] sm:$0xff]  ;;  %v532_v58 = vld [vmem:[#allocation8 + $0x28] sm:$0xff]  ;;  %v533_v60 = vld [vmem:[#allocation8 + $0x30] sm:$0xff] }
  0x93   : > { %943 = vmatpush3.bf16.msra.mxu1 %v942_v24  ;;  %v963_v56 = vpack.c.bf16 %v530_v55, %v529_v53  ;;  %v966_v59 = vpack.c.bf16 %v532_v58, %v531_v57  ;;  %v534_v61 = vld [vmem:[#allocation8 + $0x38] sm:$0xff]  ;;  %v535_v63 = vld [vmem:[#allocation8 + $0x40] sm:$0xff]  ;;  %v537_v3 = vld [vmem:[#allocation8 + $0x50] sm:$0xff] }
  0x94   : > { %944 = vmatprep.subr.bf16.mxu1 %v1261_v0  ;;  %v969_v62 = vpack.c.bf16 %v534_v61, %v533_v60  ;;  %v538_v4 = vld [vmem:[#allocation8 + $0x58] sm:$0xff]  ;;  %v539_v6 = vld [vmem:[#allocation8 + $0x60] sm:$0xff]  ;;  %v540_v7 = vld [vmem:[#allocation8 + $0x68] sm:$0xff] }
  0x95   : > { %922 = vmatpush3.bf16.msra.mxu0 %v921_v21  ;;  %v975_v5 = vpack.c.bf16 %v538_v4, %v537_v3  ;;  %v978_v8 = vpack.c.bf16 %v540_v7, %v539_v6  ;;  %v748_v9 = vld [vmem:[%s1616_s2] ss:$0 sm:$0xff]  ;;  %v542_v15 = vld [vmem:[#allocation8 + $0x78] sm:$0xff] }
  0x96   : > { %923 = vmatprep.subr.bf16.mxu0 %v1261_v0  ;;  %v541_v14 = vld [vmem:[#allocation8 + $0x70] sm:$0xff] }
  0x97   : > { %946 = vmatpush3.bf16.msra.mxu1 %v945_v30  ;;  %v981_v16 = vpack.c.bf16 %v542_v15, %v541_v14  ;;  %v749_v17 = vld [vmem:[%s1618_s4] ss:$0 sm:$0xff] }
  0x98   : > { %947 = vmatprep.subr.bf16.mxu1 %v1261_v0  ;;  %v750_v21 = vld [vmem:[%s1620_s6] ss:$0 sm:$0xff] }
  0x99   : > { %925 = vmatpush3.bf16.msra.mxu0 %v924_v27 }
  0x9a   : > { %926 = vmatprep.subr.bf16.mxu0 %v1261_v0 }
  0x9b   : > { %949 = vmatpush3.bf16.msra.mxu1 %v948_v36 }
  0x9c   : > { %950 = vmatprep.subr.bf16.mxu1 %v1261_v0 }
  0x9d   : > { %928 = vmatpush3.bf16.msra.mxu0 %v927_v33 }
  0x9e   : > { %929 = vmatprep.subr.bf16.mxu0 %v1261_v0 }
  0x9f   : > { %952 = vmatpush3.bf16.msra.mxu1 %v951_v42 }
  0xa0   : > { %953 = vmatprep.subr.bf16.mxu1 %v1261_v0 }
  0xa1   : > { %931 = vmatpush3.bf16.msra.mxu0 %v930_v39 }
  0xa2   : > { %932 = vmatprep.subr.bf16.mxu0 %v1261_v0 }
  0xa3   : > { %955 = vmatpush3.bf16.msra.mxu1 %v954_v46 }
  0xa4   : > { %956 = vmatprep.subr.bf16.mxu1 %v1261_v0 }
  0xa5   : > { %934 = vmatpush3.bf16.msra.mxu0 %v933_v45 }
  0xa6   : > { %959 = vmatprep.subr.bf16.mxu0 %v1261_v0 }
  0xa7   : > { %958 = vmatpush3.bf16.msra.mxu1 %v957_v50 }
  0xa8   : > { %839 = vmatmul.mubr.f32.vlgmr.msra.gmra.mrb[0].mxu0 %v338_v47 }
  0xa9   : > { %908 = vmatprep.mubr.msk.f32.mxu0 %vm1262_vm0, %v1263_v1  ;;  %961 = vmatpush3.bf16.msra.mxu0 %v960_v54  ;;  %v536_v1 = vld [vmem:[#allocation8 + $0x48] sm:$0xff] }
  0xaa   : > { %962 = vmatprep.subr.bf16.mxu0 %v1261_v0  ;;  %v972_v2 = vpack.c.bf16 %v536_v1, %v535_v63 }
  0xad   : > { %964 = vmatpush3.bf16.msra.mxu0 %v963_v56 }
  0xae   : > { %965 = vmatprep.subr.bf16.mxu0 %v1261_v0 }
  0xb1   : > { %967 = vmatpush3.bf16.msra.mxu0 %v966_v59 }
  0xb2   : > { %968 = vmatprep.subr.bf16.mxu0 %v1261_v0 }
  0xb5   : > { %970 = vmatpush3.bf16.msra.mxu0 %v969_v62 }
  0xb6   : > { %971 = vmatprep.subr.bf16.mxu0 %v1261_v0 }
  0xb9   : > { %973 = vmatpush3.bf16.msra.mxu0 %v972_v2 }
  0xba   : > { %974 = vmatprep.subr.bf16.mxu0 %v1261_v0 }
  0xbd   : > { %976 = vmatpush3.bf16.msra.mxu0 %v975_v5 }
  0xbe   : > { %977 = vmatprep.subr.bf16.mxu0 %v1261_v0 }
  0xc1   : > { %979 = vmatpush3.bf16.msra.mxu0 %v978_v8 }
  0xc2   : > { %980 = vmatprep.subr.bf16.mxu0 %v1261_v0 }
  0xc5   : > { %982 = vmatpush3.bf16.msra.mxu0 %v981_v16 }
 0x17b   : > { %v428_v10 = vpop.f32.mrb[0].mxu0 }
 0x17c   : > { %v429_v11 = vadd.f32 %v748_v9, %v428_v10  ;;  %v840_v12 = vpop.f32.mrb[1].mxu0 }
 0x17e   : > { %v432_v13 = vmax.f32 %v429_v11, 0.0 }
 0x180   : > { %874 = vmatmul.mubr.f32.vlgmr.msra.gmra.mrb[0].mxu1 %v432_v13 }
 0x253   : > { %v522_v0 = vpop.f32.mrb[0].mxu1 }
 0x254   : > { %v523_v18 = vadd.f32 %v749_v17, %v522_v0  ;;  %v875_v19 = vpop.f32.mrb[1].mxu1 }
 0x256   : > { %v526_v20 = vmax.f32 %v523_v18, 0.0 }
 0x258   : > { %909 = vmatmul.mubr.f32.vlgmr.msra.gmra.mrb[2].mxu0 %v526_v20 }
 0x32b   : > { %v616_v22 = vpop.f32.mrb[2].mxu0 }
 0x32c   : > { %v617_v23 = vadd.f32 %v750_v21, %v616_v22  ;;  %v910_v24 = vpop.f32.mrb[3].mxu0 }
 0x32e   : > { %620 = vst [vmem:[%s337_s20] sm:$0xff] %v617_v23 }
 0x32f   : > { %1192 = shalt.err (!%p1189_p4)
}
 0x330   : > { %s1193_s8 = scalar_lea.hbm %s1570_s21, 128  ;;  %s1197_s11 = scalar_lea.hbm %s1621_s7, 256 }
 0x331   : > { %p1194_p0 = scmp.ne.s32.totalorder %s1570_s21, %s1193_s8  ;;  %p1198_p8 = scmp.lt.u32.totalorder %s1570_s21, %s1621_s7 }
 0x332   : > { %p1199_p13 = scmp.lt.u32.totalorder %s1197_s11, %s1193_s8  ;;  %p1201_p10 = scmp.lt.u32.totalorder %s1193_s8, %s1570_s21 }
 0x333   : > { %p1195_p9 = pnand %p1194_p0, %p1459_p5 }
 0x334   : > { %p1200_p6 = por %p1199_p13, %p1198_p8 }
 0x335   : > { %p1196_p11 = pneg %p1195_p9 }
 0x336   : > { %p1202_p3 = por %p1201_p10, %p1200_p6 }
 0x338   : > { %p1203_p7 = pnand %p1202_p3, %p1196_p11 }
 0x33a   : > { %1206 = shalt.err (!%p1203_p7)
}
 0x33b   : > { %997 = dma.vmem_to_hbm [thread:$0]  (%p1459_p5), %s1572_s15, 128, %s1570_s21, %s622_s16  }
 0x33c PF: > { %s1641_s20 = sld [smem:[#allocation15_spill]]  ;;  %s647_s29 = sand.u32 1, %s1241_s24  }
 0x33d   : > { %p1643_p1 = scmp.ge.s32.totalorder %s1253_s27, 2  ;;  %s648_s12 = scalar_lea.sflag [#allocation4], %s647_s29 }
 0x342   : > { %p1642_p12 = scmp.ne.s32.totalorder %s1641_s20, 0 }
 0x344   : > { %p1014_p2 = pnand %p1643_p1, %p1642_p12 }
 0x346   : > { %1236 = dma.done.wait (!%p1014_p2), %s648_s12, 128  }
 0x347   : > { %1238 = vsyncadd (!%p1014_p2), %s648_s12, 4294967168  ;;  %p22_p4 = scmp.ge.s32.totalorder %s1445_s22, 4   ;;  %s1644_s24 = smov %s1245_s25 }
 0x348   : > { %s1645_s25 = smov %s1249_s26  ;;  %s1646_s26 = smov %s1455_s18 }
 0x349   : > { %s1647_s27 = smov %s1445_s22  ;;  %24 = sbr.rel (!%p22_p4) target bundleno = 7 (0x7), region = 105 }
 0x350   :  { %653 = vsyncpa [#allocation3], 1 }
 0x351   :  { %655 = vsyncpa [#allocation3 + $0x1], 1 }
 0x352   :  { %656 = vsyncpa [#allocation6], 1 }
 0x353   :  { %657 = vsyncpa [#allocation9], 1 }
 0x354   :  { %658 = vsyncpa [#allocation4], 1 }
 0x355   :  { %660 = vsyncpa [#allocation4 + $0x1], 1 }

// kernel: tpu_custom_call.1
= control target key start
LH: loop header
LB: loop body
LE: loop exit
PB: predicated region body
PF: predicated region fallthrough
CT: control target
= control target key end

     0   :  { %8 = vsyncpa [#allocation4], 0  ;;  %s1016_s0 = inlined_call_operand.hbm [shape: f32[256,128], index: 0, kind: input, shape index: {}]   ;;  %s1017_s1 = inlined_call_operand.hbm [shape: f32[128,128], index: 1, kind: input, shape index: {}]   ;;  %s1018_s2 = inlined_call_operand.hbm [shape: f32[1,128], index: 2, kind: input, shape index: {}]   ;;  %s1019_s3 = inlined_call_operand.hbm [shape: f32[256,128], index: 3, kind: output, shape index: {}]  }
   0x1   :  { %9 = vsyncpa [#allocation7], 0 }
   0x2   :  { %10 = vsyncpa [#allocation5], 0  ;;  %s892_s12 = smov [#allocation6]   ;;  %s893_s14 = smov [#allocation3]  }
   0x3   :  { %s28_s13 = sshll.u32 %s892_s12, 4  ;;  %s16_s15 = sshll.u32 %s893_s14, 4  ;;  %s29_s13 = int_to_ptr.vmem [resolvable:$true] %s28_s13  ;;  %s918_s15 = int_to_ptr.vmem [resolvable:$true] %s16_s15 }
   0x4   :  { %s798_s18 = scalar_lea.hbm %s1017_s1, 2048 }
   0x5   :  { %p799_p0 = scmp.ne.s32.totalorder %s1017_s1, %s798_s18  ;;  %p802_p1 = scmp.lt.u32.totalorder %s798_s18, %s1017_s1 }
   0x7   :  { %p804_p2 = pnand %p802_p1, %p799_p0 }
   0x9   :  { %807 = shalt.err (!%p804_p2)
}
   0xa   :  { %s808_s23 = scalar_lea.vmem %s29_s13, 2048  ;;  %p813_p4 = scmp.lt.s32.totalorder %s29_s13, %s29_s13 }
   0xb   :  { %p809_p3 = scmp.ne.s32.totalorder %s29_s13, %s808_s23  ;;  %p814_p5 = scmp.lt.s32.totalorder %s808_s23, %s808_s23 }
   0xd   :  { %p815_p6 = por %p814_p5, %p813_p4 }
   0xf   :  { %p816_p7 = pnand %p815_p6, %p809_p3 }
  0x11   :  { %819 = shalt.err (!%p816_p7)
}
  0x12   :  { %s894_s24 = smov 128   ;;  %s895_s25 = smov 8  }
  0x13   :  { %34 = dma.hbm_to_vmem [thread:$0]  %s1017_s1, 2048, %s29_s13, [#allocation7], %s894_s24, %s894_s24, %s895_s25  }
  0x14   :  { %s820_s30 = scalar_lea.hbm %s1016_s0, 4096 }
  0x15   :  { %p821_p8 = scmp.ne.s32.totalorder %s1016_s0, %s820_s30  ;;  %p824_p9 = scmp.lt.u32.totalorder %s820_s30, %s1016_s0 }
  0x17   :  { %p826_p10 = pnand %p824_p9, %p821_p8 }
  0x19   :  { %829 = shalt.err (!%p826_p10)
}
  0x1a   :  { %s830_s8 = scalar_lea.vmem %s918_s15, 4096  ;;  %p835_p12 = scmp.lt.s32.totalorder %s918_s15, %s918_s15 }
  0x1b   :  { %p831_p11 = scmp.ne.s32.totalorder %s918_s15, %s830_s8  ;;  %p836_p13 = scmp.lt.s32.totalorder %s830_s8, %s830_s8 }
  0x1d   :  { %p837_p0 = por %p836_p13, %p835_p12 }
  0x1f   :  { %p838_p1 = pnand %p837_p0, %p831_p11 }
  0x21   :  { %841 = shalt.err (!%p838_p1)
}
  0x22   :  { %22 = dma.hbm_to_vmem [thread:$0]  %s1016_s0, 4096, %s918_s15, [#allocation4], %s894_s24, %s894_s24, %s895_s25  }
  0x23   :  { %s896_s10 = smov [#allocation8]   ;;  %s842_s14 = scalar_lea.hbm %s1018_s2, 16 }
  0x24   :  { %s41_s11 = sshll.u32 %s896_s10, 4  ;;  %p843_p2 = scmp.ne.s32.totalorder %s1018_s2, %s842_s14  ;;  %s42_s11 = int_to_ptr.vmem [resolvable:$true] %s41_s11 }
  0x25   :  { %p846_p3 = scmp.lt.u32.totalorder %s842_s14, %s1018_s2 }
  0x27   :  { %p848_p4 = pnand %p846_p3, %p843_p2 }
  0x29   :  { %851 = shalt.err (!%p848_p4)
}
  0x2a   :  { %s852_s20 = scalar_lea.vmem %s42_s11, 16  ;;  %s856_s0 = scalar_lea.vmem %s42_s11, 32 }
  0x2b   :  { %p853_p5 = scmp.ne.s32.totalorder %s42_s11, %s852_s20  ;;  %p857_p6 = scmp.lt.s32.totalorder %s42_s11, %s42_s11 }
  0x2c   :  { %p858_p7 = scmp.lt.s32.totalorder %s856_s0, %s852_s20 }
  0x2e   :  { %p859_p8 = por %p858_p7, %p857_p6 }
  0x30   :  { %p860_p9 = pnand %p859_p8, %p853_p5 }
  0x32   :  { %863 = shalt.err (!%p860_p9)
}
  0x33   :  { %44 = dma.hbm_to_vmem [thread:$0]  %s1018_s2, 16, %s42_s11, [#allocation7]  }
  0x34   :  { %886 = dma.done.wait [#allocation4], 4096  }
  0x35   :  { %887 = vsyncadd [#allocation4], 4294963200 }
  0x36   :  { %888 = dma.done.wait [#allocation7], 2064  }
  0x37   :  { %889 = vsyncadd [#allocation7], 4294965232  ;;  %v154_v0 = vld [vmem:[#allocation6] sm:$0xff]  ;;  %v155_v1 = vld [vmem:[#allocation6 + $0x8] sm:$0xff]  ;;  %s897_s2 = smov [#allocation9]  }
  0x38   :  { %v156_v2 = vld [vmem:[#allocation6 + $0x10] sm:$0xff]  ;;  %v744_v3 = vpack.c.bf16 %v155_v1, %v154_v0  ;;  %v157_v4 = vld [vmem:[#allocation6 + $0x18] sm:$0xff]  ;;  %v158_v6 = vld [vmem:[#allocation6 + $0x20] sm:$0xff]  ;;  %s602_s22 = sshll.u32 %s897_s2, 4  ;;  %s603_s22 = int_to_ptr.vmem [resolvable:$true] %s602_s22 }
  0x39   :  { %v748_v5 = vpack.c.bf16 %v157_v4, %v156_v2  ;;  %v159_v7 = vld [vmem:[#allocation6 + $0x28] sm:$0xff]  ;;  %v122_v9 = vld [vmem:[#allocation3] sm:$0xff]  ;;  %v160_v11 = vld [vmem:[#allocation6 + $0x30] sm:$0xff]  ;;  %s864_s23 = scalar_lea.vmem %s603_s22, 4096  ;;  %p869_p11 = scmp.lt.s32.totalorder %s603_s22, %s603_s22 }
  0x3a   :  { %745 = vmatprep.subr.bf16.mxu0 %v744_v3  ;;  %776 = vmatprep.subr.bf16.mxu1 %v744_v3  ;;  %v752_v8 = vpack.c.bf16 %v159_v7, %v158_v6  ;;  %v138_v10 = vld [vmem:[#allocation3 + $0x80] sm:$0xff]  ;;  %v161_v12 = vld [vmem:[#allocation6 + $0x38] sm:$0xff]  ;;  %v163_v15 = vld [vmem:[#allocation6 + $0x48] sm:$0xff]  ;;  %p865_p10 = scmp.ne.s32.totalorder %s603_s22, %s864_s23  ;;  %p870_p12 = scmp.lt.s32.totalorder %s864_s23, %s864_s23 }
  0x3b   :  { %747 = vmatpush3.bf16.msra.mxu0 %v744_v3  ;;  %784 = vmatpush3.bf16.msra.mxu1 %v744_v3  ;;  %v756_v13 = vpack.c.bf16 %v161_v12, %v160_v11  ;;  %v162_v14 = vld [vmem:[#allocation6 + $0x40] sm:$0xff]  ;;  %v164_v17 = vld [vmem:[#allocation6 + $0x50] sm:$0xff]  ;;  %v165_v18 = vld [vmem:[#allocation6 + $0x58] sm:$0xff] }
  0x3c   :  { %749 = vmatprep.subr.bf16.mxu0 %v748_v5  ;;  %777 = vmatprep.subr.bf16.mxu1 %v748_v5  ;;  %v760_v16 = vpack.c.bf16 %v163_v15, %v162_v14  ;;  %v764_v19 = vpack.c.bf16 %v165_v18, %v164_v17  ;;  %v166_v20 = vld [vmem:[#allocation6 + $0x60] sm:$0xff]  ;;  %v167_v21 = vld [vmem:[#allocation6 + $0x68] sm:$0xff]  ;;  %v168_v23 = vld [vmem:[#allocation6 + $0x70] sm:$0xff]  ;;  %p871_p13 = por %p870_p12, %p869_p11 }
  0x3d   :  { %696 = vmatprep.mubr.f32.mxu0 %v122_v9  ;;  %720 = vmatprep.mubr.f32.mxu1 %v138_v10  ;;  %v768_v22 = vpack.c.bf16 %v167_v21, %v166_v20  ;;  %v169_v24 = vld [vmem:[#allocation6 + $0x78] sm:$0xff]  ;;  %v123_v26 = vld [vmem:[#allocation3 + $0x8] sm:$0xff]  ;;  %v124_v28 = vld [vmem:[#allocation3 + $0x10] sm:$0xff] }
  0x3e   :  { %v772_v25 = vpack.c.bf16 %v169_v24, %v168_v23  ;;  %v139_v27 = vld [vmem:[#allocation3 + $0x88] sm:$0xff]  ;;  %v140_v29 = vld [vmem:[#allocation3 + $0x90] sm:$0xff]  ;;  %v125_v30 = vld [vmem:[#allocation3 + $0x18] sm:$0xff]  ;;  %p872_p0 = pnand %p871_p13, %p865_p10 }
  0x3f   :  { %751 = vmatpush3.bf16.msra.mxu0 %v748_v5  ;;  %785 = vmatpush3.bf16.msra.mxu1 %v748_v5  ;;  %v141_v31 = vld [vmem:[#allocation3 + $0x98] sm:$0xff]  ;;  %v126_v32 = vld [vmem:[#allocation3 + $0x20] sm:$0xff]  ;;  %v127_v34 = vld [vmem:[#allocation3 + $0x28] sm:$0xff] }
  0x40   :  { %753 = vmatprep.subr.bf16.mxu0 %v752_v8  ;;  %778 = vmatprep.subr.bf16.mxu1 %v752_v8  ;;  %v142_v33 = vld [vmem:[#allocation3 + $0xa0] sm:$0xff]  ;;  %v143_v35 = vld [vmem:[#allocation3 + $0xa8] sm:$0xff]  ;;  %v128_v36 = vld [vmem:[#allocation3 + $0x30] sm:$0xff] }
  0x41   :  { %v144_v37 = vld [vmem:[#allocation3 + $0xb0] sm:$0xff]  ;;  %v129_v38 = vld [vmem:[#allocation3 + $0x38] sm:$0xff]  ;;  %v130_v40 = vld [vmem:[#allocation3 + $0x40] sm:$0xff] }
  0x42   :  { %v145_v39 = vld [vmem:[#allocation3 + $0xb8] sm:$0xff]  ;;  %v146_v41 = vld [vmem:[#allocation3 + $0xc0] sm:$0xff]  ;;  %v131_v42 = vld [vmem:[#allocation3 + $0x48] sm:$0xff] }
  0x43   :  { %755 = vmatpush3.bf16.msra.mxu0 %v752_v8  ;;  %786 = vmatpush3.bf16.msra.mxu1 %v752_v8  ;;  %v147_v43 = vld [vmem:[#allocation3 + $0xc8] sm:$0xff]  ;;  %v132_v44 = vld [vmem:[#allocation3 + $0x50] sm:$0xff]  ;;  %v133_v46 = vld [vmem:[#allocation3 + $0x58] sm:$0xff] }
  0x44   :  { %757 = vmatprep.subr.bf16.mxu0 %v756_v13  ;;  %779 = vmatprep.subr.bf16.mxu1 %v756_v13  ;;  %v148_v45 = vld [vmem:[#allocation3 + $0xd0] sm:$0xff]  ;;  %v149_v47 = vld [vmem:[#allocation3 + $0xd8] sm:$0xff]  ;;  %v134_v48 = vld [vmem:[#allocation3 + $0x60] sm:$0xff] }
  0x45   :  { %v150_v49 = vld [vmem:[#allocation3 + $0xe0] sm:$0xff]  ;;  %v135_v50 = vld [vmem:[#allocation3 + $0x68] sm:$0xff]  ;;  %v136_v52 = vld [vmem:[#allocation3 + $0x70] sm:$0xff] }
  0x46   :  { %v151_v51 = vld [vmem:[#allocation3 + $0xe8] sm:$0xff]  ;;  %v152_v53 = vld [vmem:[#allocation3 + $0xf0] sm:$0xff]  ;;  %v137_v54 = vld [vmem:[#allocation3 + $0x78] sm:$0xff] }
  0x47   :  { %759 = vmatpush3.bf16.msra.mxu0 %v756_v13  ;;  %787 = vmatpush3.bf16.msra.mxu1 %v756_v13  ;;  %v153_v55 = vld [vmem:[#allocation3 + $0xf8] sm:$0xff]  ;;  %v967_v56 = vld [vmem:[#allocation8] ss:$0 sm:$0xff] }
  0x48   :  { %761 = vmatprep.subr.bf16.mxu0 %v760_v16  ;;  %780 = vmatprep.subr.bf16.mxu1 %v760_v16 }
  0x4b   :  { %763 = vmatpush3.bf16.msra.mxu0 %v760_v16  ;;  %788 = vmatpush3.bf16.msra.mxu1 %v760_v16 }
  0x4c   :  { %765 = vmatprep.subr.bf16.mxu0 %v764_v19  ;;  %781 = vmatprep.subr.bf16.mxu1 %v764_v19 }
  0x4f   :  { %767 = vmatpush3.bf16.msra.mxu0 %v764_v19  ;;  %789 = vmatpush3.bf16.msra.mxu1 %v764_v19 }
  0x50   :  { %769 = vmatprep.subr.bf16.mxu0 %v768_v22  ;;  %782 = vmatprep.subr.bf16.mxu1 %v768_v22 }
  0x53   :  { %771 = vmatpush3.bf16.msra.mxu0 %v768_v22  ;;  %790 = vmatpush3.bf16.msra.mxu1 %v768_v22 }
  0x54   :  { %773 = vmatprep.subr.bf16.mxu0 %v772_v25  ;;  %783 = vmatprep.subr.bf16.mxu1 %v772_v25 }
  0x57   :  { %775 = vmatpush3.bf16.msra.mxu0 %v772_v25  ;;  %791 = vmatpush3.bf16.msra.mxu1 %v772_v25 }
  0x5a   :  { %697 = vmatmul.mubr.f32.vlgmr.msra.gmra.mrb[0].mxu0 %v123_v26  ;;  %721 = vmatmul.mubr.f32.vlgmr.msra.gmra.mrb[0].mxu1 %v139_v27 }
  0x5b   :  { %699 = vmatprep.mubr.f32.mxu0 %v124_v28  ;;  %723 = vmatprep.mubr.f32.mxu1 %v140_v29 }
  0x5e   :  { %700 = vmatmul.mubr.f32.gmra.mrb[2].mxu0 %v125_v30  ;;  %724 = vmatmul.mubr.f32.gmra.mrb[2].mxu1 %v141_v31 }
  0x5f   :  { %702 = vmatprep.mubr.f32.mxu0 %v126_v32  ;;  %726 = vmatprep.mubr.f32.mxu1 %v142_v33 }
  0x62   :  { %703 = vmatmul.mubr.f32.gmra.mrb[4].mxu0 %v127_v34  ;;  %727 = vmatmul.mubr.f32.gmra.mrb[4].mxu1 %v143_v35 }
  0x63   :  { %705 = vmatprep.mubr.f32.mxu0 %v128_v36  ;;  %729 = vmatprep.mubr.f32.mxu1 %v144_v37 }
  0x66   :  { %706 = vmatmul.mubr.f32.gmra.mrb[6].mxu0 %v129_v38  ;;  %730 = vmatmul.mubr.f32.gmra.mrb[6].mxu1 %v145_v39 }
  0x67   :  { %708 = vmatprep.mubr.f32.mxu0 %v130_v40  ;;  %732 = vmatprep.mubr.f32.mxu1 %v146_v41 }
  0x6a   :  { %709 = vmatmul.mubr.f32.gmra.mrb[8].mxu0 %v131_v42  ;;  %733 = vmatmul.mubr.f32.gmra.mrb[8].mxu1 %v147_v43 }
  0x6b   :  { %711 = vmatprep.mubr.f32.mxu0 %v132_v44  ;;  %735 = vmatprep.mubr.f32.mxu1 %v148_v45 }
  0x6e   :  { %712 = vmatmul.mubr.f32.gmra.mrb[10].mxu0 %v133_v46  ;;  %736 = vmatmul.mubr.f32.gmra.mrb[10].mxu1 %v149_v47 }
  0x6f   :  { %714 = vmatprep.mubr.f32.mxu0 %v134_v48  ;;  %738 = vmatprep.mubr.f32.mxu1 %v150_v49 }
  0x72   :  { %715 = vmatmul.mubr.f32.gmra.mrb[12].mxu0 %v135_v50  ;;  %739 = vmatmul.mubr.f32.gmra.mrb[12].mxu1 %v151_v51 }
  0x73   :  { %717 = vmatprep.mubr.f32.mxu0 %v136_v52  ;;  %741 = vmatprep.mubr.f32.mxu1 %v152_v53 }
  0x76   :  { %718 = vmatmul.mubr.f32.gmra.mrb[14].mxu0 %v137_v54  ;;  %742 = vmatmul.mubr.f32.gmra.mrb[14].mxu1 %v153_v55 }
 0x12d   :  { %v698_v57 = vpop.f32.mrb[0].mxu0  ;;  %v722_v58 = vpop.f32.mrb[0].mxu1 }
 0x12e   :  { %v502_v59 = vadd.f32 %v698_v57, %v967_v56  ;;  %v518_v60 = vadd.f32 %v722_v58, %v967_v56  ;;  %v236_v61 = vpop.f32.mrb[1].mxu0  ;;  %v316_v62 = vpop.f32.mrb[1].mxu1 }
 0x12f   :  { %v501_v63 = vadd.f32 %v967_v56, %v236_v61  ;;  %v517_v0 = vadd.f32 %v967_v56, %v316_v62 }
 0x130   :  { %v534_v1 = vmax.f32 %v502_v59, 0.0  ;;  %v550_v2 = vmax.f32 %v518_v60, 0.0 }
 0x131   :  { %v533_v3 = vmax.f32 %v501_v63, 0.0  ;;  %v549_v4 = vmax.f32 %v517_v0, 0.0  ;;  %v701_v5 = vpop.f32.mrb[2].mxu0  ;;  %v725_v6 = vpop.f32.mrb[2].mxu1 }
 0x132   :  { %566 = vst [vmem:[#allocation9 + $0x8] sm:$0xff] %v534_v1  ;;  %582 = vst [vmem:[#allocation9 + $0x88] sm:$0xff] %v550_v2  ;;  %v504_v7 = vadd.f32 %v701_v5, %v967_v56  ;;  %v520_v8 = vadd.f32 %v725_v6, %v967_v56  ;;  %v246_v9 = vpop.f32.mrb[3].mxu0  ;;  %v326_v10 = vpop.f32.mrb[3].mxu1 }
 0x133   :  { %565 = vst [vmem:[#allocation9] sm:$0xff] %v533_v3  ;;  %581 = vst [vmem:[#allocation9 + $0x80] sm:$0xff] %v549_v4  ;;  %v503_v11 = vadd.f32 %v967_v56, %v246_v9  ;;  %v519_v12 = vadd.f32 %v967_v56, %v326_v10 }
 0x134   :  { %v536_v13 = vmax.f32 %v504_v7, 0.0  ;;  %v552_v14 = vmax.f32 %v520_v8, 0.0 }
 0x135   :  { %v535_v15 = vmax.f32 %v503_v11, 0.0  ;;  %v551_v16 = vmax.f32 %v519_v12, 0.0  ;;  %v704_v17 = vpop.f32.mrb[4].mxu0  ;;  %v728_v18 = vpop.f32.mrb[4].mxu1 }
 0x136   :  { %568 = vst [vmem:[#allocation9 + $0x18] sm:$0xff] %v536_v13  ;;  %584 = vst [vmem:[#allocation9 + $0x98] sm:$0xff] %v552_v14  ;;  %v506_v19 = vadd.f32 %v704_v17, %v967_v56  ;;  %v522_v20 = vadd.f32 %v728_v18, %v967_v56  ;;  %v256_v21 = vpop.f32.mrb[5].mxu0  ;;  %v336_v22 = vpop.f32.mrb[5].mxu1 }
 0x137   :  { %567 = vst [vmem:[#allocation9 + $0x10] sm:$0xff] %v535_v15  ;;  %583 = vst [vmem:[#allocation9 + $0x90] sm:$0xff] %v551_v16  ;;  %v505_v23 = vadd.f32 %v967_v56, %v256_v21  ;;  %v521_v24 = vadd.f32 %v967_v56, %v336_v22 }
 0x138   :  { %v538_v25 = vmax.f32 %v506_v19, 0.0  ;;  %v554_v26 = vmax.f32 %v522_v20, 0.0 }
 0x139   :  { %v537_v27 = vmax.f32 %v505_v23, 0.0  ;;  %v553_v28 = vmax.f32 %v521_v24, 0.0  ;;  %v707_v29 = vpop.f32.mrb[6].mxu0  ;;  %v731_v30 = vpop.f32.mrb[6].mxu1 }
 0x13a   :  { %570 = vst [vmem:[#allocation9 + $0x28] sm:$0xff] %v538_v25  ;;  %586 = vst [vmem:[#allocation9 + $0xa8] sm:$0xff] %v554_v26  ;;  %v508_v31 = vadd.f32 %v707_v29, %v967_v56  ;;  %v524_v32 = vadd.f32 %v731_v30, %v967_v56  ;;  %v266_v33 = vpop.f32.mrb[7].mxu0  ;;  %v346_v34 = vpop.f32.mrb[7].mxu1 }
 0x13b   :  { %569 = vst [vmem:[#allocation9 + $0x20] sm:$0xff] %v537_v27  ;;  %585 = vst [vmem:[#allocation9 + $0xa0] sm:$0xff] %v553_v28  ;;  %v507_v35 = vadd.f32 %v967_v56, %v266_v33  ;;  %v523_v36 = vadd.f32 %v967_v56, %v346_v34 }
 0x13c   :  { %v540_v37 = vmax.f32 %v508_v31, 0.0  ;;  %v556_v38 = vmax.f32 %v524_v32, 0.0 }
 0x13d   :  { %v539_v39 = vmax.f32 %v507_v35, 0.0  ;;  %v555_v40 = vmax.f32 %v523_v36, 0.0  ;;  %v710_v41 = vpop.f32.mrb[8].mxu0  ;;  %v734_v42 = vpop.f32.mrb[8].mxu1 }
 0x13e   :  { %572 = vst [vmem:[#allocation9 + $0x38] sm:$0xff] %v540_v37  ;;  %588 = vst [vmem:[#allocation9 + $0xb8] sm:$0xff] %v556_v38  ;;  %v510_v43 = vadd.f32 %v710_v41, %v967_v56  ;;  %v526_v44 = vadd.f32 %v734_v42, %v967_v56  ;;  %v276_v45 = vpop.f32.mrb[9].mxu0  ;;  %v356_v46 = vpop.f32.mrb[9].mxu1 }
 0x13f   :  { %571 = vst [vmem:[#allocation9 + $0x30] sm:$0xff] %v539_v39  ;;  %587 = vst [vmem:[#allocation9 + $0xb0] sm:$0xff] %v555_v40  ;;  %v509_v47 = vadd.f32 %v967_v56, %v276_v45  ;;  %v525_v48 = vadd.f32 %v967_v56, %v356_v46 }
 0x140   :  { %v542_v49 = vmax.f32 %v510_v43, 0.0  ;;  %v558_v50 = vmax.f32 %v526_v44, 0.0 }
 0x141   :  { %v541_v51 = vmax.f32 %v509_v47, 0.0  ;;  %v557_v52 = vmax.f32 %v525_v48, 0.0  ;;  %v713_v53 = vpop.f32.mrb[10].mxu0  ;;  %v737_v54 = vpop.f32.mrb[10].mxu1 }
 0x142   :  { %574 = vst [vmem:[#allocation9 + $0x48] sm:$0xff] %v542_v49  ;;  %590 = vst [vmem:[#allocation9 + $0xc8] sm:$0xff] %v558_v50  ;;  %v512_v55 = vadd.f32 %v713_v53, %v967_v56  ;;  %v528_v57 = vadd.f32 %v737_v54, %v967_v56  ;;  %v286_v58 = vpop.f32.mrb[11].mxu0  ;;  %v366_v59 = vpop.f32.mrb[11].mxu1 }
 0x143   :  { %573 = vst [vmem:[#allocation9 + $0x40] sm:$0xff] %v541_v51  ;;  %589 = vst [vmem:[#allocation9 + $0xc0] sm:$0xff] %v557_v52  ;;  %v511_v60 = vadd.f32 %v967_v56, %v286_v58  ;;  %v527_v61 = vadd.f32 %v967_v56, %v366_v59 }
 0x144   :  { %v544_v62 = vmax.f32 %v512_v55, 0.0  ;;  %v560_v63 = vmax.f32 %v528_v57, 0.0 }
 0x145   :  { %v543_v0 = vmax.f32 %v511_v60, 0.0  ;;  %v559_v1 = vmax.f32 %v527_v61, 0.0  ;;  %v716_v2 = vpop.f32.mrb[12].mxu0  ;;  %v740_v3 = vpop.f32.mrb[12].mxu1 }
 0x146   :  { %576 = vst [vmem:[#allocation9 + $0x58] sm:$0xff] %v544_v62  ;;  %592 = vst [vmem:[#allocation9 + $0xd8] sm:$0xff] %v560_v63  ;;  %v514_v4 = vadd.f32 %v716_v2, %v967_v56  ;;  %v530_v5 = vadd.f32 %v740_v3, %v967_v56  ;;  %v296_v6 = vpop.f32.mrb[13].mxu0  ;;  %v376_v7 = vpop.f32.mrb[13].mxu1 }
 0x147   :  { %575 = vst [vmem:[#allocation9 + $0x50] sm:$0xff] %v543_v0  ;;  %591 = vst [vmem:[#allocation9 + $0xd0] sm:$0xff] %v559_v1  ;;  %v513_v8 = vadd.f32 %v967_v56, %v296_v6  ;;  %v529_v9 = vadd.f32 %v967_v56, %v376_v7 }
 0x148   :  { %v546_v10 = vmax.f32 %v514_v4, 0.0  ;;  %v562_v11 = vmax.f32 %v530_v5, 0.0 }
 0x149   :  { %v545_v12 = vmax.f32 %v513_v8, 0.0  ;;  %v561_v13 = vmax.f32 %v529_v9, 0.0  ;;  %v719_v14 = vpop.f32.mrb[14].mxu0  ;;  %v743_v15 = vpop.f32.mrb[14].mxu1 }
 0x14a   :  { %578 = vst [vmem:[#allocation9 + $0x68] sm:$0xff] %v546_v10  ;;  %594 = vst [vmem:[#allocation9 + $0xe8] sm:$0xff] %v562_v11  ;;  %v516_v16 = vadd.f32 %v719_v14, %v967_v56  ;;  %v532_v17 = vadd.f32 %v743_v15, %v967_v56  ;;  %v306_v18 = vpop.f32.mrb[15].mxu0  ;;  %v386_v19 = vpop.f32.mrb[15].mxu1 }
 0x14b   :  { %577 = vst [vmem:[#allocation9 + $0x60] sm:$0xff] %v545_v12  ;;  %593 = vst [vmem:[#allocation9 + $0xe0] sm:$0xff] %v561_v13  ;;  %v515_v20 = vadd.f32 %v967_v56, %v306_v18  ;;  %v531_v21 = vadd.f32 %v967_v56, %v386_v19 }
 0x14c   :  { %v548_v22 = vmax.f32 %v516_v16, 0.0  ;;  %v564_v23 = vmax.f32 %v532_v17, 0.0 }
 0x14d   :  { %v547_v24 = vmax.f32 %v515_v20, 0.0  ;;  %v563_v25 = vmax.f32 %v531_v21, 0.0 }
 0x14e   :  { %580 = vst [vmem:[#allocation9 + $0x78] sm:$0xff] %v548_v22  ;;  %596 = vst [vmem:[#allocation9 + $0xf8] sm:$0xff] %v564_v23 }
 0x14f   :  { %579 = vst [vmem:[#allocation9 + $0x70] sm:$0xff] %v547_v24  ;;  %595 = vst [vmem:[#allocation9 + $0xf0] sm:$0xff] %v563_v25 }
 0x150   :  { %875 = shalt.err (!%p872_p0)
}
 0x151   :  { %s876_s28 = scalar_lea.hbm %s1019_s3, 4096 }
 0x152   :  { %p877_p1 = scmp.ne.s32.totalorder %s1019_s3, %s876_s28  ;;  %p880_p2 = scmp.lt.u32.totalorder %s876_s28, %s1019_s3 }
 0x154   :  { %p882_p3 = pnand %p880_p2, %p877_p1 }
 0x156   :  { %885 = shalt.err (!%p882_p3)
}
 0x157   :  { %608 = dma.vmem_to_hbm [thread:$0]  %s603_s22, 4096, %s1019_s3, [#allocation5], %s894_s24, %s894_s24, %s895_s25  }
 0x158   :  { %890 = dma.done.wait [#allocation5], 4096  }
 0x159   :  { %891 = vsyncadd [#allocation5], 4294963200 }
 0x15a   :  { %612 = vsyncpa [#allocation4], 1 }
 0x15b   :  { %613 = vsyncpa [#allocation7], 1 }
 0x15c   :  { %614 = vsyncpa [#allocation5], 1 }

</bundles_post_ra>
